<compile_context>
chip_gen: v6e
topology: v6e:2x2x1
jax: 0.10.0
libtpu: 0.0.40
codegen_flags: <defaults>
</compile_context>

<pallas_src>
import jax
import jax.numpy as jnp
from jax.experimental import pallas as pl
from jax.experimental.pallas import tpu as pltpu

IN_FEATURES = 3000
HIDDEN = 1000
OUT = 1
NEG_SLOPE = 0.01  # PyTorch LeakyReLU default negative_slope

IN_PAD = 3072    # next multiple of 128 >= 3000
HID_PAD = 1024   # next multiple of 128 >= 1000
TK = 512         # K tile -> IN_PAD / TK = 6 pipelined grid steps
KT = IN_PAD // TK


def classification_net_kernel(x_ref, w1_ref, b1_ref, w2_ref, b2_ref, o_ref, acc_ref):
    k = pl.program_id(0)

    @pl.when(k == 0)
    def _():
        acc_ref[...] = jnp.zeros_like(acc_ref)

    # Layer 1 partial product: (B, TK) @ (TK, HID_PAD), f32 accumulation.
    # W1 tile is DMA'd as bf16 (half the HBM bytes), upcast on the VPU.
    w1 = w1_ref[...].astype(jnp.float32)
    acc_ref[...] += jnp.dot(x_ref[...], w1, preferred_element_type=jnp.float32)

    @pl.when(k == pl.num_programs(0) - 1)
    def _():
        h = acc_ref[...] + b1_ref[...]                     # bias (padded cols are 0)
        h = jnp.where(h >= 0.0, h, NEG_SLOPE * h)          # LeakyReLU
        # Dropout(p=0.6): identity at inference (eval mode).
        # TODO(synk): training-mode stochastic dropout (pltpu PRNG masking) not implemented.
        w2 = w2_ref[...].astype(jnp.float32)               # (1, HID_PAD) row
        # N=1 "matmul" as VPU multiply + lane reduction (avoids a wasted MXU pass).
        z = jnp.sum(h * w2, axis=-1, keepdims=True) + b2_ref[...]   # (B, 1)
        o_ref[...] = 1.0 / (1.0 + jnp.exp(-z))             # sigmoid


def classification_net(x, w1, b1, w2, b2):
    """x: (B, 3000); w1: (3000, 1000); b1: (1, 1000); w2: (1000, 1); b2: (1, 1)."""
    B = x.shape[0]
    Bp = max(8, ((B + 7) // 8) * 8)  # sublane-align the batch

    x_p = jnp.zeros((Bp, IN_PAD), jnp.float32).at[:B, :IN_FEATURES].set(
        x.astype(jnp.float32))
    w1_p = jnp.zeros((IN_PAD, HID_PAD), jnp.bfloat16).at[:IN_FEATURES, :HIDDEN].set(
        w1.astype(jnp.bfloat16))
    b1_p = jnp.zeros((1, HID_PAD), jnp.float32).at[:, :HIDDEN].set(
        b1.reshape(1, HIDDEN).astype(jnp.float32))
    w2_p = jnp.zeros((1, HID_PAD), jnp.bfloat16).at[:, :HIDDEN].set(
        w2.reshape(1, HIDDEN).astype(jnp.bfloat16))
    b2_p = b2.reshape(1, 1).astype(jnp.float32)

    out = pl.pallas_call(
        classification_net_kernel,
        out_shape=jax.ShapeDtypeStruct((Bp, OUT), jnp.float32),
        grid_spec=pltpu.PrefetchScalarGridSpec(
            num_scalar_prefetch=0,
            grid=(KT,),
            in_specs=[
                pl.BlockSpec((Bp, TK), lambda k: (0, k)),       # x K-tile
                pl.BlockSpec((TK, HID_PAD), lambda k: (k, 0)),  # W1 K-tile (bf16)
                pl.BlockSpec((1, HID_PAD), lambda k: (0, 0)),   # b1 (resident)
                pl.BlockSpec((1, HID_PAD), lambda k: (0, 0)),   # w2 row (resident)
                pl.BlockSpec((1, 1), lambda k: (0, 0)),         # b2 scalar
            ],
            out_specs=pl.BlockSpec((Bp, OUT), lambda k: (0, 0)),
            scratch_shapes=[pltpu.VMEM((Bp, HID_PAD), jnp.float32)],
        ),
        compiler_params=pltpu.CompilerParams(
            dimension_semantics=("arbitrary",),      # K is a reduction axis
            vmem_limit_bytes=32 << 20,               # fits v5e/v6e/v7x
        ),
    )(x_p, w1_p, b1_p, w2_p, b2_p)
    return out[:B]


def xavier_uniform(key, fan_in, fan_out, gain):
    bound = gain * (6.0 / (fan_in + fan_out)) ** 0.5
    return jax.random.uniform(key, (fan_in, fan_out), jnp.float32, -bound, bound)


def linear_bias(key, fan_in, n_out):
    # PyTorch nn.Linear default bias init: U(-1/sqrt(fan_in), 1/sqrt(fan_in))
    bound = 1.0 / (fan_in ** 0.5)
    return jax.random.uniform(key, (1, n_out), jnp.float32, -bound, bound)


def reference_forward(x, w1, b1, w2, b2):
    # Mirror the kernel's numerics: bf16-stored weights, f32 compute.
    w1b = w1.astype(jnp.bfloat16).astype(jnp.float32)
    w2b = w2.astype(jnp.bfloat16).astype(jnp.float32)
    h = x.astype(jnp.float32) @ w1b + b1.reshape(1, HIDDEN)
    h = jnp.where(h >= 0.0, h, NEG_SLOPE * h)
    z = h @ w2b + b2.reshape(1, 1)
    return jax.nn.sigmoid(z)


if __name__ == "__main__":
    key = jax.random.PRNGKey(0)
    kx, kw1, kb1, kw2, kb2 = jax.random.split(key, 5)

    B = 8
    x = jax.random.normal(kx, (B, IN_FEATURES), jnp.float32)

    gain = 2.0 ** 0.5  # nn.init.calculate_gain('relu')
    w1 = xavier_uniform(kw1, IN_FEATURES, HIDDEN, gain)
    b1 = linear_bias(kb1, IN_FEATURES, HIDDEN)
    w2 = xavier_uniform(kw2, HIDDEN, OUT, gain)
    b2 = linear_bias(kb2, HIDDEN, OUT)

    out = classification_net(x, w1, b1, w2, b2)
    out = jax.block_until_ready(out)

    ref = reference_forward(x, w1, b1, w2, b2)
    assert out.shape == (B, OUT)
    assert jnp.allclose(out, ref, atol=1e-3, rtol=1e-3), "mismatch vs JAX reference"

    print("KERNEL_OK")
</pallas_src>

<mosaic_0001>
module attributes {stable_mosaic.version = 11 : i64} {
  func.func @classification_net_kernel(%arg0: i32, %arg1: memref<8x512xf32, #tpu.memory_space<vmem>>, %arg2: memref<512x1024xbf16, #tpu.memory_space<vmem>>, %arg3: memref<1x1024xf32, #tpu.memory_space<vmem>>, %arg4: memref<1x1024xbf16, #tpu.memory_space<vmem>>, %arg5: memref<1x1xf32, #tpu.memory_space<vmem>>, %arg6: memref<8x1xf32, #tpu.memory_space<vmem>>, %arg7: memref<8x1024xf32, #tpu.memory_space<vmem>>) attributes {dimension_semantics = [#tpu.dimension_semantics<arbitrary>], iteration_bounds = array<i64: 6>, scalar_prefetch = 0 : i64, scratch_operands = 1 : i64, tpu.core_type = #tpu.core_type<tc>, window_params = [{transform_indices = @transform_0, window_bounds = array<i64: 8, 512>}, {transform_indices = @transform_1, window_bounds = array<i64: 512, 1024>}, {pipeline_mode = #tpu.pipeline_mode<synchronous>, transform_indices = @transform_2, window_bounds = array<i64: 1, 1024>}, {pipeline_mode = #tpu.pipeline_mode<synchronous>, transform_indices = @transform_3, window_bounds = array<i64: 1, 1024>}, {pipeline_mode = #tpu.pipeline_mode<synchronous>, transform_indices = @transform_4, window_bounds = array<i64: 1, 1>}, {pipeline_mode = #tpu.pipeline_mode<synchronous>, transform_indices = @transform_5, window_bounds = array<i64: 8, 1>}]} {
    %c0_i32 = arith.constant 0 : i32
    %0 = arith.cmpi eq, %arg0, %c0_i32 : i32
    %1 = arith.extui %0 : i1 to i32
    %c0_i32_0 = arith.constant 0 : i32
    %2 = arith.cmpi ne, %1, %c0_i32_0 : i32
    scf.if %2 {
      %cst_9 = arith.constant 0.000000e+00 : f32
      %13 = vector.broadcast %cst_9 : f32 to vector<8x1024xf32>
      %c0_10 = arith.constant 0 : index
      %c0_11 = arith.constant 0 : index
      %14 = vector.load %arg7[%c0_10, %c0_11] : memref<8x1024xf32, #tpu.memory_space<vmem>>, vector<8x1024xf32>
      tpu.vector_store %arg7[%c0_10, %c0_11], %13 {strides = array<i32>} : memref<8x1024xf32, #tpu.memory_space<vmem>>, vector<8x1024xf32>,
    } else {
    }
    %c0 = arith.constant 0 : index
    %c0_1 = arith.constant 0 : index
    %3 = vector.load %arg2[%c0, %c0_1] : memref<512x1024xbf16, #tpu.memory_space<vmem>>, vector<512x1024xbf16>
    %4 = arith.extf %3 : vector<512x1024xbf16> to vector<512x1024xf32>
    %c0_2 = arith.constant 0 : index
    %c0_3 = arith.constant 0 : index
    %5 = vector.load %arg7[%c0_2, %c0_3] : memref<8x1024xf32, #tpu.memory_space<vmem>>, vector<8x1024xf32>
    %c0_4 = arith.constant 0 : index
    %c0_5 = arith.constant 0 : index
    %6 = vector.load %arg1[%c0_4, %c0_5] : memref<8x512xf32, #tpu.memory_space<vmem>>, vector<8x512xf32>
    %cst = arith.constant dense<0.000000e+00> : vector<8x1024xf32>
    %7 = tpu.matmul %6, %4, %cst {dimension_numbers = #tpu.dot_dimension_numbers<[1], [0], [0], [1], [0, 0, 1, 1], [], []>} : vector<8x512xf32>, vector<512x1024xf32>, vector<8x1024xf32> -> vector<8x1024xf32>
    %8 = arith.addf %5, %7 : vector<8x1024xf32>
    %c0_6 = arith.constant 0 : index
    %c0_7 = arith.constant 0 : index
    %9 = vector.load %arg7[%c0_6, %c0_7] : memref<8x1024xf32, #tpu.memory_space<vmem>>, vector<8x1024xf32>
    tpu.vector_store %arg7[%c0_6, %c0_7], %8 {strides = array<i32>} : memref<8x1024xf32, #tpu.memory_space<vmem>>, vector<8x1024xf32>,
    %c5_i32 = arith.constant 5 : i32
    %10 = arith.cmpi eq, %arg0, %c5_i32 : i32
    %11 = arith.extui %10 : i1 to i32
    %c0_i32_8 = arith.constant 0 : i32
    %12 = arith.cmpi ne, %11, %c0_i32_8 : i32
    scf.if %12 {
      %c0_9 = arith.constant 0 : index
      %c0_10 = arith.constant 0 : index
      %13 = vector.load %arg7[%c0_9, %c0_10] : memref<8x1024xf32, #tpu.memory_space<vmem>>, vector<8x1024xf32>
      %c0_11 = arith.constant 0 : index
      %c0_12 = arith.constant 0 : index
      %14 = vector.load %arg3[%c0_11, %c0_12] : memref<1x1024xf32, #tpu.memory_space<vmem>>, vector<1x1024xf32>
      %15 = vector.broadcast %14 : vector<1x1024xf32> to vector<8x1024xf32>
      %16 = arith.addf %13, %15 : vector<8x1024xf32>
      %cst_13 = arith.constant 0.000000e+00 : f32
      %17 = vector.broadcast %cst_13 : f32 to vector<8x1024xf32>
      %18 = arith.cmpf oge, %16, %17 : vector<8x1024xf32>
      %cst_14 = arith.constant 0.00999999977 : f32
      %19 = vector.broadcast %cst_14 : f32 to vector<8x1024xf32>
      %20 = arith.mulf %19, %16 : vector<8x1024xf32>
      %21 = arith.select %18, %16, %20 : vector<8x1024xi1>, vector<8x1024xf32>
      %c0_15 = arith.constant 0 : index
      %c0_16 = arith.constant 0 : index
      %22 = vector.load %arg4[%c0_15, %c0_16] : memref<1x1024xbf16, #tpu.memory_space<vmem>>, vector<1x1024xbf16>
      %23 = arith.extf %22 : vector<1x1024xbf16> to vector<1x1024xf32>
      %24 = vector.broadcast %23 : vector<1x1024xf32> to vector<8x1024xf32>
      %25 = arith.mulf %21, %24 : vector<8x1024xf32>
      %cst_17 = arith.constant dense<0.000000e+00> : vector<8xf32>
      %26 = vector.multi_reduction <add>, %25, %cst_17 [1] : vector<8x1024xf32> to vector<8xf32>
      %27 = vector.shape_cast %26 : vector<8xf32> to vector<8x1xf32>
      %c0_18 = arith.constant 0 : index
      %c0_19 = arith.constant 0 : index
      %28 = vector.load %arg5[%c0_18, %c0_19] : memref<1x1xf32, #tpu.memory_space<vmem>>, vector<1x1xf32>
      %29 = vector.broadcast %28 : vector<1x1xf32> to vector<8x1xf32>
      %30 = arith.addf %27, %29 : vector<8x1xf32>
      %cst_20 = arith.constant 0.000000e+00 : f32
      %31 = vector.broadcast %cst_20 : f32 to vector<8x1xf32>
      %32 = arith.subf %31, %30 : vector<8x1xf32>
      %33 = math.exp %32 : vector<8x1xf32>
      %cst_21 = arith.constant 1.000000e+00 : f32
      %34 = vector.broadcast %cst_21 : f32 to vector<8x1xf32>
      %35 = arith.addf %34, %33 : vector<8x1xf32>
      %cst_22 = arith.constant 1.000000e+00 : f32
      %36 = vector.broadcast %cst_22 : f32 to vector<8x1xf32>
      %37 = arith.divf %36, %35 : vector<8x1xf32>
      %c0_23 = arith.constant 0 : index
      %c0_24 = arith.constant 0 : index
      %38 = vector.load %arg6[%c0_23, %c0_24] : memref<8x1xf32, #tpu.memory_space<vmem>>, vector<8x1xf32>
      tpu.vector_store %arg6[%c0_23, %c0_24], %37 {strides = array<i32>} : memref<8x1xf32, #tpu.memory_space<vmem>>, vector<8x1xf32>,
    } else {
    }
    return
  }
  func.func @transform_0(%arg0: i32) -> (i32, i32) {
    %c0_i32 = arith.constant 0 : i32
    %c0_i32_0 = arith.constant 0 : i32
    return %c0_i32, %arg0 : i32, i32
  }
  func.func @transform_1(%arg0: i32) -> (i32, i32) {
    %c0_i32 = arith.constant 0 : i32
    %c0_i32_0 = arith.constant 0 : i32
    return %arg0, %c0_i32 : i32, i32
  }
  func.func @transform_2(%arg0: i32) -> (i32, i32) {
    %c0_i32 = arith.constant 0 : i32
    %c0_i32_0 = arith.constant 0 : i32
    %c0_i32_1 = arith.constant 0 : i32
    return %c0_i32, %c0_i32_0 : i32, i32
  }
  func.func @transform_3(%arg0: i32) -> (i32, i32) {
    %c0_i32 = arith.constant 0 : i32
    %c0_i32_0 = arith.constant 0 : i32
    %c0_i32_1 = arith.constant 0 : i32
    return %c0_i32, %c0_i32_0 : i32, i32
  }
  func.func @transform_4(%arg0: i32) -> (i32, i32) {
    %c0_i32 = arith.constant 0 : i32
    %c0_i32_0 = arith.constant 0 : i32
    %c0_i32_1 = arith.constant 0 : i32
    return %c0_i32, %c0_i32_0 : i32, i32
  }
  func.func @transform_5(%arg0: i32) -> (i32, i32) {
    %c0_i32 = arith.constant 0 : i32
    %c0_i32_0 = arith.constant 0 : i32
    %c0_i32_1 = arith.constant 0 : i32
    return %c0_i32, %c0_i32_0 : i32, i32
  }
}

</mosaic_0001>

<bundles_post_ra>
// kernel: tpu_custom_call.1
= control target key start
LH: loop header
LB: loop body
LE: loop exit
PB: predicated region body
PF: predicated region fallthrough
CT: control target
= control target key end

     0   :  { %s2763_s0 = inlined_call_operand.hbm [shape: f32[8,3072], index: 0, kind: input, shape index: {}]   ;;  %s2764_s1 = inlined_call_operand.hbm [shape: bf16[3072,1024], index: 1, kind: input, shape index: {}]   ;;  %s2765_s2 = inlined_call_operand.hbm [shape: f32[1,1024], index: 2, kind: input, shape index: {}]   ;;  %s2766_s3 = inlined_call_operand.hbm [shape: bf16[1,1024], index: 3, kind: input, shape index: {}]   ;;  %s2767_s4 = inlined_call_operand.<no memory space> [shape: f32[1,1], index: 4, kind: input, shape index: {}]   ;;  %s2768_s5 = inlined_call_operand.vmem [shape: f32[8,1], index: 5, kind: output, shape index: {}]  }
   0x1   :  { %v10_v0 = vstv %s2767_s4 }
   0x2   :  { %11 = vst [vmem:[#allocation3] sm:$0x1] %v10_v0 }
   0x3   :  { %12 = vsyncpa [#allocation5], 0 }
   0x4   :  { %14 = vsyncpa [#allocation5 + $0x1], 0 }
   0x5   :  { %15 = vsyncpa [#allocation7], 0 }
   0x6   :  { %17 = vsyncpa [#allocation7 + $0x1], 0 }
   0x7   :  { %18 = vsyncpa [#allocation10], 0  ;;  %s2248_s20 = smov 0   ;;  %s2250_s21 = smov 0  }
   0x8   :  { %s2252_s22 = smov 0   ;;  %s2254_s23 = smov 0  }
   0x9 LB: > { %s2267_s4 = sadd.s32 4294967295, %s2206_s23   ;;  %p44_p0 = scmp.ne.s32.totalorder %s2198_s21, %s2194_s20  ;;  %s2206_s23 = sphi %s2254_s23, %s2786_s23   ;;  %s2202_s22 = sphi %s2252_s22, %s2785_s22   ;;  %s2198_s21 = sphi %s2250_s21, %s2784_s21   ;;  %s2194_s20 = sphi %s2248_s20, %s2783_s20  }
   0xa   : > { %p2769_p1 = scmp.eq.s32.totalorder %s2267_s4, 0  ;;  %p1952_p2 = scmp.ge.s32.totalorder %s2206_s23, 1 }
   0xb   : > { %p165_p3 = scmp.lt.s32.totalorder %s2206_s23, 7  ;;  %s2208_s26 = smov [#allocation8]  }
   0xc   : > { %p2276_p5 = por %p2769_p1, %p44_p0  ;;  %s178_s27 = sshll.u32 %s2208_s26, 4  ;;  %s179_s27 = int_to_ptr.vmem [resolvable:$true] %s178_s27 }
   0xd   : > { %p2280_p6 = pnand %p1952_p2, %p165_p3  ;;  %s2209_s28 = smov [#allocation9]  }
   0xe   : > { %s2772_s24 = scalar_select %p2276_p5, 1, 0 }
   0xf   : > { %s2773_s25 = scalar_select %p2280_p6, 1, 0 }
  0x10   : > { %p1988_p7 = pneg %p2280_p6  ;;  %s189_s29 = sshll.u32 %s2209_s28, 4  ;;  %s190_s29 = int_to_ptr.vmem [resolvable:$true] %s189_s29 }
  0x11   : > { %s2293_s6 = sadd.s32 1, %s2206_s23   ;;  %s2063_s8 = scalar_lea.vmem %s179_s27, 128 }
  0x12   : > { %p2288_p8 = pnand %p1988_p7, %p2769_p1  ;;  %s28_s7 = ssub.s32 %s2206_s23, %s2293_s6 }
  0x13   : > { %p2064_p10 = scmp.ne.s32.totalorder %s179_s27, %s2063_s8  ;;  %p2071_p13 = scmp.lt.s32.totalorder %s179_s27, %s179_s27 }
  0x14   : > { %p2054_p9 = pneg %p2288_p8  ;;  %p2072_p0 = scmp.lt.s32.totalorder %s2063_s8, %s2063_s8 }
  0x16   : > { %p2066_p11 = pnand %p2064_p10, %p2054_p9  ;;  %p2073_p2 = por %p2072_p0, %p2071_p13 }
  0x18   : > { %p2067_p12 = pneg %p2066_p11 }
  0x1a   : > { %p2074_p3 = pnand %p2073_p2, %p2067_p12 }
  0x1c   : > { %2077 = shalt.err (!%p2074_p3)
}
  0x1d   : > { %1991 = dma.hbm_to_vmem [thread:$0]  (!%p2288_p8), %s2765_s2, 128, %s179_s27, [#allocation7]  }
  0x1e   : > { %s2089_s11 = scalar_lea.vmem %s190_s29, 128  ;;  %p2097_p10 = scmp.lt.s32.totalorder %s190_s29, %s190_s29 }
  0x1f   : > { %p2090_p7 = scmp.ne.s32.totalorder %s190_s29, %s2089_s11  ;;  %p2098_p11 = scmp.lt.s32.totalorder %s2089_s11, %s2089_s11 }
  0x21   : > { %p2092_p4 = pnand %p2090_p7, %p2054_p9  ;;  %p2099_p5 = por %p2098_p11, %p2097_p10 }
  0x23   : > { %p2093_p1 = pneg %p2092_p4 }
  0x25   : > { %p2100_p6 = pnand %p2099_p5, %p2093_p1 }
  0x27   : > { %2103 = shalt.err (!%p2100_p6)
}
  0x28   : > { %1994 = dma.hbm_to_vmem [thread:$0]  (!%p2288_p8), %s2766_s3, 128, %s190_s29, [#allocation10]  }
  0x29   : > { %p29_p4 = scmp.eq.s32.totalorder %s28_s7, 0  ;;  %s31_s14 = sadd.s32 1, %s2202_s22 }
  0x2a   : > { %p38_p9 = scmp.ne.s32.totalorder %s2202_s22, %s2198_s21  ;;  %p39_p12 = scmp.eq.s32.totalorder %s2206_s23, 0 }
  0x2b   : > { %s2320_s15 = scalar_select %p29_p4, %s2202_s22, %s31_s14  }
  0x2c   : > { %p40_p1 = por %p39_p12, %p38_p9  ;;  %p2004_p5 = scmp.lt.s32.totalorder %s2206_s23, 6 }
  0x2d   : > { %s2324_s16 = sand.u32 1, %s2202_s22   ;;  %s1973_s17 = sshll.u32 %s2206_s23, 9 }
  0x2e   : > { %s1956_s18 = sshll.u32 %s2324_s16, 5  ;;  %s2331_s26 = scalar_lea.hbm %s2763_s0, %s1973_s17 }
  0x2f   : > { %s207_s27 = scalar_lea.vmem [#allocation4], %s1956_s18  ;;  %p2333_p6 = pnand %p2004_p5, %p40_p1 }
  0x30   : > { %s215_s28 = sshll.u32 %s207_s27, 4  ;;  %s1959_s30 = sshll.u32 %s2324_s16, 11  ;;  %s216_s28 = int_to_ptr.vmem [resolvable:$true] %s215_s28 }
  0x31   : > { %s204_s7 = scalar_lea.sflag [#allocation5], %s2324_s16  ;;  %s2104_s8 = scalar_lea.hbm %s2331_s26, 512 }
  0x32   : > { %p2105_p8 = scmp.ne.s32.totalorder %s2331_s26, %s2104_s8  ;;  %p2106_p13 = pneg %p2333_p6 }
  0x33   : > { %s2109_s11 = scalar_lea.hbm %s2763_s0, 3072  ;;  %p2110_p3 = scmp.lt.s32.totalorder %s2331_s26, %s2763_s0 }
  0x34   : > { %p2107_p0 = pnand %p2106_p13, %p2105_p8  ;;  %p2111_p7 = scmp.lt.s32.totalorder %s2109_s11, %s2104_s8 }
  0x36   : > { %p2108_p2 = pneg %p2107_p0  ;;  %p2112_p10 = por %p2111_p7, %p2110_p3 }
  0x38   : > { %p2113_p11 = pnand %p2112_p10, %p2108_p2 }
  0x3a   : > { %2116 = shalt.err (!%p2113_p11)
}
  0x3b   : > { %s2117_s14 = scalar_lea.vmem %s216_s28, 512  ;;  %s2210_s16 = smov [#allocation4]  }
  0x3c   : > { %p2118_p4 = scmp.ne.s32.totalorder %s216_s28, %s2117_s14  ;;  %s2122_s17 = sshll.u32 %s2210_s16, 4  ;;  %s2123_s17 = int_to_ptr.vmem [resolvable:$false] %s2122_s17 }
  0x3d   : > { %s2124_s18 = scalar_lea.vmem %s2123_s17, 1024  ;;  %p2125_p1 = scmp.lt.s32.totalorder %s216_s28, %s2123_s17 }
  0x3e   : > { %p2120_p9 = pnand %p2118_p4, %p2106_p13  ;;  %p2126_p5 = scmp.lt.s32.totalorder %s2124_s18, %s2117_s14 }
  0x40   : > { %p2121_p12 = pneg %p2120_p9  ;;  %p2127_p8 = por %p2126_p5, %p2125_p1 }
  0x42   : > { %p2128_p0 = pnand %p2127_p8, %p2121_p12 }
  0x44   : > { %2131 = shalt.err (!%p2128_p0)
}
  0x45   : > { %1998 = dma.hbm_to_vmem [thread:$0]  (!%p2333_p6), %s2331_s26, 512, %s216_s28, %s204_s7  }
  0x46   : > { %s226_s19 = scalar_lea.vmem [#allocation6], %s1959_s30  ;;  %s222_s27 = sand.u32 1, %s2206_s23  }
  0x47   : > { %s234_s20 = sshll.u32 %s226_s19, 4  ;;  %s1975_s8 = sshll.u32 %s2206_s23, 15  ;;  %s2360_s20 = int_to_ptr.vmem [resolvable:$true] %s234_s20 }
  0x48   : > { %s2366_s11 = scalar_lea.hbm %s2764_s1, %s1975_s8  ;;  %s2368_s12 = scalar_lea.sflag [#allocation7], %s222_s27 }
  0x49   : > { %s2132_s13 = scalar_lea.hbm %s2366_s11, 32768  ;;  %s2137_s23 = scalar_lea.hbm %s2764_s1, 196608 }
  0x4a   : > { %p2133_p2 = scmp.ne.s32.totalorder %s2366_s11, %s2132_s13  ;;  %p2138_p10 = scmp.lt.s32.totalorder %s2366_s11, %s2764_s1 }
  0x4b   : > { %p2139_p11 = scmp.lt.s32.totalorder %s2137_s23, %s2132_s13 }
  0x4c   : > { %p2135_p3 = pnand %p2133_p2, %p2106_p13 }
  0x4d   : > { %p2140_p4 = por %p2139_p11, %p2138_p10 }
  0x4e   : > { %p2136_p7 = pneg %p2135_p3 }
  0x50   : > { %p2141_p9 = pnand %p2140_p4, %p2136_p7 }
  0x52   : > { %2144 = shalt.err (!%p2141_p9)
}
  0x53   : > { %s2145_s14 = scalar_lea.vmem %s2360_s20, 32768  ;;  %s2211_s16 = smov [#allocation6]  }
  0x54   : > { %p2146_p12 = scmp.ne.s32.totalorder %s2360_s20, %s2145_s14  ;;  %s2150_s17 = sshll.u32 %s2211_s16, 4  ;;  %s2151_s17 = int_to_ptr.vmem [resolvable:$false] %s2150_s17 }
  0x55   : > { %s2152_s18 = scalar_lea.vmem %s2151_s17, 65536  ;;  %p2153_p8 = scmp.lt.s32.totalorder %s2360_s20, %s2151_s17 }
  0x56   : > { %p2148_p1 = pnand %p2146_p12, %p2106_p13  ;;  %p2154_p0 = scmp.lt.s32.totalorder %s2152_s18, %s2145_s14 }
  0x58   : > { %p2149_p5 = pneg %p2148_p1  ;;  %p2155_p2 = por %p2154_p0, %p2153_p8 }
  0x5a   : > { %p2156_p3 = pnand %p2155_p2, %p2149_p5 }
  0x5c   : > { %2159 = shalt.err (!%p2156_p3)
}
  0x5d   : > { %s2212_s19 = smov 512   ;;  %s2213_s27 = smov 32  }
  0x5e   : > { %2001 = dma.hbm_to_vmem [thread:$0]  (!%p2333_p6), %s2366_s11, 32768, %s2360_s20, %s2368_s12, %s2212_s19, %s2212_s19, %s2213_s27  }
  0x5f   : > { %p2776_p13 = scmp.ne.s32.totalorder %s2773_s25, 0 }
  0x60   : > { %s248_s8 = sand.u32 (!%p2776_p13), 1, %s2198_s21   ;;  %p2777_p7 = scmp.ne.s32.totalorder (!%p2776_p13), %s2772_s24, 0 }
  0x61   : > { %246 = sbr.rel (%p2776_p13) target bundleno = 799 (0x31f), region = 40  ;;  %s1964_s9 = sshll.u32 (!%p2776_p13), %s248_s8, 5 }
  0x62   : > { %s249_s10 = scalar_lea.sflag (!%p2776_p13), [#allocation5], %s248_s8  ;;  %s2396_s13 = scalar_lea.vmem (!%p2776_p13), [#allocation4], %s1964_s9 }
  0x66   : > { %2177 = dma.done.wait (%p2777_p7), %s249_s10, 512  }
  0x67   : > { %2179 = vsyncadd (%p2777_p7), %s249_s10, 4294966784  ;;  %s257_s26 = sand.u32 1, %s2267_s4   ;;  %s1965_s29 = sshll.u32 %s248_s8, 11 }
  0x68   : > { %s258_s20 = scalar_lea.sflag [#allocation7], %s257_s26  ;;  %s2403_s11 = scalar_lea.vmem [#allocation6], %s1965_s29 }
  0x69   : > { %2181 = dma.done.wait (%p2777_p7), %s258_s20, 32768  }
  0x6a   : > { %2183 = vsyncadd (%p2777_p7), %s258_s20, 4294934528  ;;  %p2778_p6 = scmp.eq.s32.totalorder %s2267_s4, 0 }
  0x6c   : > { %2185 = dma.done.wait (%p2778_p6), [#allocation7], 128   ;;  %p2779_p10 = pmov %p2778_p6 }
  0x6d   : > { %p2780_p11 = pmov %p2778_p6 }
  0x6e   : > { %2187 = vsyncadd (%p2779_p10), [#allocation7], 4294967168 }
  0x6f   : > { %2189 = dma.done.wait (%p2780_p11), [#allocation10], 128   ;;  %p2781_p4 = pmov %p2778_p6 }
  0x70   : > { %p2782_p9 = scmp.ne.s32.totalorder %s2267_s4, 0 }
  0x71   : > { %2191 = vsyncadd (%p2781_p4), [#allocation10], 4294967168 }
  0x72   : > { %301 = sbr.rel (%p2782_p9) target bundleno = 124 (0x7c), region = 60 }
  0x77   : > { %v2214_v1 = vmov 0.0  }
  0x78   : > { %302 = vst [vmem:[#allocation2 + $0x30] sm:$0xff] %v2214_v1  ;;  %303 = vst [vmem:[#allocation2] sm:$0xff] %v2214_v1 }
  0x79   : > { %304 = vst [vmem:[#allocation2 + $0x18] sm:$0xff] %v2214_v1  ;;  %305 = vst [vmem:[#allocation2 + $0x10] sm:$0xff] %v2214_v1 }
  0x7a   : > { %306 = vst [vmem:[#allocation2 + $0x8] sm:$0xff] %v2214_v1  ;;  %307 = vst [vmem:[#allocation2 + $0x20] sm:$0xff] %v2214_v1 }
  0x7b   : > { %308 = vst [vmem:[#allocation2 + $0x28] sm:$0xff] %v2214_v1  ;;  %309 = vst [vmem:[#allocation2 + $0x38] sm:$0xff] %v2214_v1 }
  0x7c PF: > { %v370_v2 = vld [vmem:[%s2403_s11 + $0x1e0] sm:$0xff]  ;;  %p1969_p12 = scmp.ne.s32.totalorder %s2267_s4, 5 }
  0x7d   : > { %v498_v3 = vld [vmem:[%s2403_s11 + $0x5e0] sm:$0xff]  ;;  %v687_v5 = vunpack.c.h.bf16 %v370_v2  ;;  %v686_v7 = vunpack.c.l.bf16 %v370_v2 }
  0x7e   : > { %v366_v4 = vld [vmem:[%s2403_s11 + $0x1c0] sm:$0xff]  ;;  %v943_v6 = vunpack.c.h.bf16 %v498_v3  ;;  %v942_v8 = vunpack.c.l.bf16 %v498_v3 }
  0x7f   : > { %v494_v9 = vld [vmem:[%s2403_s11 + $0x5c0] sm:$0xff]  ;;  %v679_v12 = vunpack.c.h.bf16 %v366_v4  ;;  %v678_v14 = vunpack.c.l.bf16 %v366_v4  ;;  %1090 = vmatprep.subr.mxu0 %v687_v5 }
  0x80   : > { %v362_v10 = vld [vmem:[%s2403_s11 + $0x1a0] sm:$0xff]  ;;  %v935_v13 = vunpack.c.h.bf16 %v494_v9  ;;  %v934_v15 = vunpack.c.l.bf16 %v494_v9  ;;  %1161 = vmatprep.subr.mxu1 %v943_v6  ;;  %1091 = vmatpush1.msra.mxu0 %v686_v7 }
  0x81   : > { %v490_v11 = vld [vmem:[%s2403_s11 + $0x5a0] sm:$0xff]  ;;  %v671_v18 = vunpack.c.h.bf16 %v362_v10  ;;  %1162 = vmatpush1.msra.mxu1 %v942_v8  ;;  %v670_v20 = vunpack.c.l.bf16 %v362_v10  ;;  %1092 = vmatprep.subr.mxu0 %v679_v12 }
  0x82   : > { %v358_v16 = vld [vmem:[%s2403_s11 + $0x180] sm:$0xff]  ;;  %v927_v19 = vunpack.c.h.bf16 %v490_v11  ;;  %v926_v21 = vunpack.c.l.bf16 %v490_v11  ;;  %1163 = vmatprep.subr.mxu1 %v935_v13  ;;  %1093 = vmatpush1.msra.mxu0 %v678_v14 }
  0x83   : > { %v486_v17 = vld [vmem:[%s2403_s11 + $0x580] sm:$0xff]  ;;  %v663_v24 = vunpack.c.h.bf16 %v358_v16  ;;  %1164 = vmatpush1.msra.mxu1 %v934_v15  ;;  %v662_v26 = vunpack.c.l.bf16 %v358_v16  ;;  %1094 = vmatprep.subr.mxu0 %v671_v18 }
  0x84   : > { %v354_v22 = vld [vmem:[%s2403_s11 + $0x160] sm:$0xff]  ;;  %v919_v25 = vunpack.c.h.bf16 %v486_v17  ;;  %v918_v27 = vunpack.c.l.bf16 %v486_v17  ;;  %1165 = vmatprep.subr.mxu1 %v927_v19  ;;  %1095 = vmatpush1.msra.mxu0 %v670_v20 }
  0x85   : > { %v482_v23 = vld [vmem:[%s2403_s11 + $0x560] sm:$0xff]  ;;  %v655_v30 = vunpack.c.h.bf16 %v354_v22  ;;  %1166 = vmatpush1.msra.mxu1 %v926_v21  ;;  %v654_v32 = vunpack.c.l.bf16 %v354_v22  ;;  %1096 = vmatprep.subr.mxu0 %v663_v24 }
  0x86   : > { %v350_v28 = vld [vmem:[%s2403_s11 + $0x140] sm:$0xff]  ;;  %v911_v31 = vunpack.c.h.bf16 %v482_v23  ;;  %v910_v33 = vunpack.c.l.bf16 %v482_v23  ;;  %1167 = vmatprep.subr.mxu1 %v919_v25  ;;  %1097 = vmatpush1.msra.mxu0 %v662_v26 }
  0x87   : > { %v478_v29 = vld [vmem:[%s2403_s11 + $0x540] sm:$0xff]  ;;  %v647_v36 = vunpack.c.h.bf16 %v350_v28  ;;  %1168 = vmatpush1.msra.mxu1 %v918_v27  ;;  %v646_v38 = vunpack.c.l.bf16 %v350_v28  ;;  %1098 = vmatprep.subr.mxu0 %v655_v30 }
  0x88   : > { %v346_v34 = vld [vmem:[%s2403_s11 + $0x120] sm:$0xff]  ;;  %v903_v37 = vunpack.c.h.bf16 %v478_v29  ;;  %v902_v39 = vunpack.c.l.bf16 %v478_v29  ;;  %1169 = vmatprep.subr.mxu1 %v911_v31  ;;  %1099 = vmatpush1.msra.mxu0 %v654_v32 }
  0x89   : > { %v474_v35 = vld [vmem:[%s2403_s11 + $0x520] sm:$0xff]  ;;  %v639_v42 = vunpack.c.h.bf16 %v346_v34  ;;  %1170 = vmatpush1.msra.mxu1 %v910_v33  ;;  %v638_v44 = vunpack.c.l.bf16 %v346_v34  ;;  %1100 = vmatprep.subr.mxu0 %v647_v36 }
  0x8a   : > { %v342_v40 = vld [vmem:[%s2403_s11 + $0x100] sm:$0xff]  ;;  %v895_v43 = vunpack.c.h.bf16 %v474_v35  ;;  %v894_v45 = vunpack.c.l.bf16 %v474_v35  ;;  %1171 = vmatprep.subr.mxu1 %v903_v37  ;;  %1101 = vmatpush1.msra.mxu0 %v646_v38 }
  0x8b   : > { %v470_v41 = vld [vmem:[%s2403_s11 + $0x500] sm:$0xff]  ;;  %v631_v48 = vunpack.c.h.bf16 %v342_v40  ;;  %1172 = vmatpush1.msra.mxu1 %v902_v39  ;;  %v630_v50 = vunpack.c.l.bf16 %v342_v40  ;;  %1102 = vmatprep.subr.mxu0 %v639_v42 }
  0x8c   : > { %v338_v46 = vld [vmem:[%s2403_s11 + $0xe0] sm:$0xff]  ;;  %v887_v49 = vunpack.c.h.bf16 %v470_v41  ;;  %v886_v51 = vunpack.c.l.bf16 %v470_v41  ;;  %1173 = vmatprep.subr.mxu1 %v895_v43  ;;  %1103 = vmatpush1.msra.mxu0 %v638_v44 }
  0x8d   : > { %v466_v47 = vld [vmem:[%s2403_s11 + $0x4e0] sm:$0xff]  ;;  %v623_v54 = vunpack.c.h.bf16 %v338_v46  ;;  %1174 = vmatpush1.msra.mxu1 %v894_v45  ;;  %v622_v56 = vunpack.c.l.bf16 %v338_v46  ;;  %1104 = vmatprep.subr.mxu0 %v631_v48 }
  0x8e   : > { %v334_v52 = vld [vmem:[%s2403_s11 + $0xc0] sm:$0xff]  ;;  %v879_v55 = vunpack.c.h.bf16 %v466_v47  ;;  %v878_v57 = vunpack.c.l.bf16 %v466_v47  ;;  %1175 = vmatprep.subr.mxu1 %v887_v49  ;;  %1105 = vmatpush1.msra.mxu0 %v630_v50 }
  0x8f   : > { %v462_v53 = vld [vmem:[%s2403_s11 + $0x4c0] sm:$0xff]  ;;  %v615_v60 = vunpack.c.h.bf16 %v334_v52  ;;  %1176 = vmatpush1.msra.mxu1 %v886_v51  ;;  %v614_v62 = vunpack.c.l.bf16 %v334_v52  ;;  %1106 = vmatprep.subr.mxu0 %v623_v54 }
  0x90   : > { %v330_v58 = vld [vmem:[%s2403_s11 + $0xa0] sm:$0xff]  ;;  %v871_v61 = vunpack.c.h.bf16 %v462_v53  ;;  %v870_v63 = vunpack.c.l.bf16 %v462_v53  ;;  %1177 = vmatprep.subr.mxu1 %v879_v55  ;;  %1107 = vmatpush1.msra.mxu0 %v622_v56 }
  0x91   : > { %v458_v59 = vld [vmem:[%s2403_s11 + $0x4a0] sm:$0xff]  ;;  %v607_v2 = vunpack.c.h.bf16 %v330_v58  ;;  %1178 = vmatpush1.msra.mxu1 %v878_v57  ;;  %v606_v4 = vunpack.c.l.bf16 %v330_v58  ;;  %1108 = vmatprep.subr.mxu0 %v615_v60 }
  0x92   : > { %v326_v0 = vld [vmem:[%s2403_s11 + $0x80] sm:$0xff]  ;;  %v863_v3 = vunpack.c.h.bf16 %v458_v59  ;;  %v862_v5 = vunpack.c.l.bf16 %v458_v59  ;;  %1179 = vmatprep.subr.mxu1 %v871_v61  ;;  %1109 = vmatpush1.msra.mxu0 %v614_v62 }
  0x93   : > { %v454_v1 = vld [vmem:[%s2403_s11 + $0x480] sm:$0xff]  ;;  %v599_v8 = vunpack.c.h.bf16 %v326_v0  ;;  %1180 = vmatpush1.msra.mxu1 %v870_v63  ;;  %v598_v10 = vunpack.c.l.bf16 %v326_v0  ;;  %1110 = vmatprep.subr.mxu0 %v607_v2 }
  0x94   : > { %v322_v6 = vld [vmem:[%s2403_s11 + $0x60] sm:$0xff]  ;;  %v855_v9 = vunpack.c.h.bf16 %v454_v1  ;;  %v854_v11 = vunpack.c.l.bf16 %v454_v1  ;;  %1181 = vmatprep.subr.mxu1 %v863_v3  ;;  %1111 = vmatpush1.msra.mxu0 %v606_v4 }
  0x95   : > { %v450_v7 = vld [vmem:[%s2403_s11 + $0x460] sm:$0xff]  ;;  %v591_v14 = vunpack.c.h.bf16 %v322_v6  ;;  %1182 = vmatpush1.msra.mxu1 %v862_v5  ;;  %v590_v16 = vunpack.c.l.bf16 %v322_v6  ;;  %1112 = vmatprep.subr.mxu0 %v599_v8 }
  0x96   : > { %v318_v12 = vld [vmem:[%s2403_s11 + $0x40] sm:$0xff]  ;;  %v847_v15 = vunpack.c.h.bf16 %v450_v7  ;;  %v846_v17 = vunpack.c.l.bf16 %v450_v7  ;;  %1183 = vmatprep.subr.mxu1 %v855_v9  ;;  %1113 = vmatpush1.msra.mxu0 %v598_v10 }
  0x97   : > { %v446_v13 = vld [vmem:[%s2403_s11 + $0x440] sm:$0xff]  ;;  %v583_v20 = vunpack.c.h.bf16 %v318_v12  ;;  %1184 = vmatpush1.msra.mxu1 %v854_v11  ;;  %v582_v22 = vunpack.c.l.bf16 %v318_v12  ;;  %1114 = vmatprep.subr.mxu0 %v591_v14 }
  0x98   : > { %v314_v18 = vld [vmem:[%s2403_s11 + $0x20] sm:$0xff]  ;;  %v839_v21 = vunpack.c.h.bf16 %v446_v13  ;;  %v838_v23 = vunpack.c.l.bf16 %v446_v13  ;;  %1185 = vmatprep.subr.mxu1 %v847_v15  ;;  %1115 = vmatpush1.msra.mxu0 %v590_v16 }
  0x99   : > { %v442_v19 = vld [vmem:[%s2403_s11 + $0x420] sm:$0xff]  ;;  %v575_v26 = vunpack.c.h.bf16 %v314_v18  ;;  %1186 = vmatpush1.msra.mxu1 %v846_v17  ;;  %v574_v28 = vunpack.c.l.bf16 %v314_v18  ;;  %1116 = vmatprep.subr.mxu0 %v583_v20 }
  0x9a   : > { %v310_v24 = vld [vmem:[%s2403_s11] sm:$0xff]  ;;  %v831_v27 = vunpack.c.h.bf16 %v442_v19  ;;  %v830_v29 = vunpack.c.l.bf16 %v442_v19  ;;  %1187 = vmatprep.subr.mxu1 %v839_v21  ;;  %1117 = vmatpush1.msra.mxu0 %v582_v22 }
  0x9b   : > { %v438_v25 = vld [vmem:[%s2403_s11 + $0x400] sm:$0xff]  ;;  %v567_v32 = vunpack.c.h.bf16 %v310_v24  ;;  %1188 = vmatpush1.msra.mxu1 %v838_v23  ;;  %v566_v34 = vunpack.c.l.bf16 %v310_v24  ;;  %1118 = vmatprep.subr.mxu0 %v575_v26 }
  0x9c   : > { %v434_v30 = vld [vmem:[%s2403_s11 + $0x3e0] sm:$0xff]  ;;  %v823_v33 = vunpack.c.h.bf16 %v438_v25  ;;  %v822_v35 = vunpack.c.l.bf16 %v438_v25  ;;  %1189 = vmatprep.subr.mxu1 %v831_v27  ;;  %1119 = vmatpush1.msra.mxu0 %v574_v28 }
  0x9d   : > { %v562_v31 = vld [vmem:[%s2403_s11 + $0x7e0] sm:$0xff]  ;;  %v815_v38 = vunpack.c.h.bf16 %v434_v30  ;;  %1190 = vmatpush1.msra.mxu1 %v830_v29  ;;  %v814_v40 = vunpack.c.l.bf16 %v434_v30  ;;  %1120 = vmatprep.subr.mxu0 %v567_v32 }
  0x9e   : > { %v430_v36 = vld [vmem:[%s2403_s11 + $0x3c0] sm:$0xff]  ;;  %v1071_v39 = vunpack.c.h.bf16 %v562_v31  ;;  %v1070_v41 = vunpack.c.l.bf16 %v562_v31  ;;  %1191 = vmatprep.subr.mxu1 %v823_v33  ;;  %1121 = vmatpush1.msra.mxu0 %v566_v34 }
  0x9f   : > { %v558_v37 = vld [vmem:[%s2403_s11 + $0x7c0] sm:$0xff]  ;;  %v807_v44 = vunpack.c.h.bf16 %v430_v36  ;;  %1192 = vmatpush1.msra.mxu1 %v822_v35  ;;  %v806_v46 = vunpack.c.l.bf16 %v430_v36  ;;  %1122 = vmatprep.subr.mxu0 %v815_v38 }
  0xa0   : > { %v426_v42 = vld [vmem:[%s2403_s11 + $0x3a0] sm:$0xff]  ;;  %v1063_v45 = vunpack.c.h.bf16 %v558_v37  ;;  %v1062_v47 = vunpack.c.l.bf16 %v558_v37  ;;  %1193 = vmatprep.subr.mxu1 %v1071_v39  ;;  %1123 = vmatpush2.msra.mxu0 %v814_v40 }
  0xa1   : > { %v554_v43 = vld [vmem:[%s2403_s11 + $0x7a0] sm:$0xff]  ;;  %v799_v50 = vunpack.c.h.bf16 %v426_v42  ;;  %1194 = vmatpush2.msra.mxu1 %v1070_v41  ;;  %v798_v52 = vunpack.c.l.bf16 %v426_v42  ;;  %1124 = vmatprep.subr.mxu0 %v807_v44 }
  0xa2   : > { %v422_v48 = vld [vmem:[%s2403_s11 + $0x380] sm:$0xff]  ;;  %v1055_v51 = vunpack.c.h.bf16 %v554_v43  ;;  %v1054_v53 = vunpack.c.l.bf16 %v554_v43  ;;  %1195 = vmatprep.subr.mxu1 %v1063_v45  ;;  %1125 = vmatpush2.msra.mxu0 %v806_v46 }
  0xa3   : > { %v550_v49 = vld [vmem:[%s2403_s11 + $0x780] sm:$0xff]  ;;  %v791_v56 = vunpack.c.h.bf16 %v422_v48  ;;  %1196 = vmatpush2.msra.mxu1 %v1062_v47  ;;  %v790_v58 = vunpack.c.l.bf16 %v422_v48  ;;  %1126 = vmatprep.subr.mxu0 %v799_v50 }
  0xa4   : > { %v418_v54 = vld [vmem:[%s2403_s11 + $0x360] sm:$0xff]  ;;  %v1047_v57 = vunpack.c.h.bf16 %v550_v49  ;;  %v1046_v59 = vunpack.c.l.bf16 %v550_v49  ;;  %1197 = vmatprep.subr.mxu1 %v1055_v51  ;;  %1127 = vmatpush2.msra.mxu0 %v798_v52 }
  0xa5   : > { %v546_v55 = vld [vmem:[%s2403_s11 + $0x760] sm:$0xff]  ;;  %v783_v62 = vunpack.c.h.bf16 %v418_v54  ;;  %1198 = vmatpush2.msra.mxu1 %v1054_v53  ;;  %v782_v0 = vunpack.c.l.bf16 %v418_v54  ;;  %1128 = vmatprep.subr.mxu0 %v791_v56 }
  0xa6   : > { %v414_v60 = vld [vmem:[%s2403_s11 + $0x340] sm:$0xff]  ;;  %v1039_v63 = vunpack.c.h.bf16 %v546_v55  ;;  %v1038_v1 = vunpack.c.l.bf16 %v546_v55  ;;  %1199 = vmatprep.subr.mxu1 %v1047_v57  ;;  %1129 = vmatpush2.msra.mxu0 %v790_v58 }
  0xa7   : > { %v542_v61 = vld [vmem:[%s2403_s11 + $0x740] sm:$0xff]  ;;  %v775_v4 = vunpack.c.h.bf16 %v414_v60  ;;  %1200 = vmatpush2.msra.mxu1 %v1046_v59  ;;  %v774_v6 = vunpack.c.l.bf16 %v414_v60  ;;  %1130 = vmatprep.subr.mxu0 %v783_v62 }
  0xa8   : > { %v410_v2 = vld [vmem:[%s2403_s11 + $0x320] sm:$0xff]  ;;  %v1031_v5 = vunpack.c.h.bf16 %v542_v61  ;;  %v1030_v7 = vunpack.c.l.bf16 %v542_v61  ;;  %1201 = vmatprep.subr.mxu1 %v1039_v63  ;;  %1131 = vmatpush2.msra.mxu0 %v782_v0 }
  0xa9   : > { %v538_v3 = vld [vmem:[%s2403_s11 + $0x720] sm:$0xff]  ;;  %v767_v10 = vunpack.c.h.bf16 %v410_v2  ;;  %1202 = vmatpush2.msra.mxu1 %v1038_v1  ;;  %v766_v12 = vunpack.c.l.bf16 %v410_v2  ;;  %1132 = vmatprep.subr.mxu0 %v775_v4  ;;  %v371_v1 = vld [vmem:[%s2403_s11 + $0x1e8] sm:$0xff] }
  0xaa   : > { %v406_v8 = vld [vmem:[%s2403_s11 + $0x300] sm:$0xff]  ;;  %v1023_v11 = vunpack.c.h.bf16 %v538_v3  ;;  %v1022_v13 = vunpack.c.l.bf16 %v538_v3  ;;  %1203 = vmatprep.subr.mxu1 %v1031_v5  ;;  %1133 = vmatpush2.msra.mxu0 %v774_v6  ;;  %v499_v2 = vld [vmem:[%s2403_s11 + $0x5e8] sm:$0xff]  ;;  %v2489_v5 = vld [vmem:[%s2396_s13 + $0x18] sm:$0xff] }
  0xab   : > { %v534_v9 = vld [vmem:[%s2403_s11 + $0x700] sm:$0xff]  ;;  %v759_v16 = vunpack.c.h.bf16 %v406_v8  ;;  %1204 = vmatpush2.msra.mxu1 %v1030_v7  ;;  %v758_v18 = vunpack.c.l.bf16 %v406_v8  ;;  %1134 = vmatprep.subr.mxu0 %v767_v10  ;;  %v2486_v3 = vld [vmem:[%s2396_s13 + $0x8] sm:$0xff]  ;;  %v689_v10 = vunpack.c.h.bf16 %v371_v1 }
  0xac   : > { %v402_v14 = vld [vmem:[%s2403_s11 + $0x2e0] sm:$0xff]  ;;  %v1015_v17 = vunpack.c.h.bf16 %v534_v9  ;;  %v1014_v19 = vunpack.c.l.bf16 %v534_v9  ;;  %1205 = vmatprep.subr.mxu1 %v1023_v11  ;;  %1135 = vmatpush2.msra.mxu0 %v766_v12  ;;  %v367_v6 = vld [vmem:[%s2403_s11 + $0x1c8] sm:$0xff]  ;;  %v2497_v9 = vld [vmem:[%s2396_s13 + $0x10] sm:$0xff]  ;;  %v945_v11 = vunpack.c.h.bf16 %v499_v2  ;;  %v688_v12 = vunpack.c.l.bf16 %v371_v1 }
  0xad   : > { %v530_v15 = vld [vmem:[%s2403_s11 + $0x6e0] sm:$0xff]  ;;  %v751_v22 = vunpack.c.h.bf16 %v402_v14  ;;  %1206 = vmatpush2.msra.mxu1 %v1022_v13  ;;  %v750_v24 = vunpack.c.l.bf16 %v402_v14  ;;  %1136 = vmatprep.subr.mxu0 %v759_v16  ;;  %v495_v7 = vld [vmem:[%s2403_s11 + $0x5c8] sm:$0xff]  ;;  %v944_v13 = vunpack.c.l.bf16 %v499_v2  ;;  %v681_v16 = vunpack.c.h.bf16 %v367_v6 }
  0xae   : > { %v398_v20 = vld [vmem:[%s2403_s11 + $0x2c0] sm:$0xff]  ;;  %v1007_v23 = vunpack.c.h.bf16 %v530_v15  ;;  %v1006_v25 = vunpack.c.l.bf16 %v530_v15  ;;  %1207 = vmatprep.subr.mxu1 %v1015_v17  ;;  %1137 = vmatpush2.msra.mxu0 %v758_v18  ;;  %v363_v14 = vld [vmem:[%s2403_s11 + $0x1a8] sm:$0xff]  ;;  %v937_v17 = vunpack.c.h.bf16 %v495_v7  ;;  %v680_v18 = vunpack.c.l.bf16 %v367_v6 }
  0xaf   : > { %v526_v21 = vld [vmem:[%s2403_s11 + $0x6c0] sm:$0xff]  ;;  %v743_v28 = vunpack.c.h.bf16 %v398_v20  ;;  %1208 = vmatpush2.msra.mxu1 %v1014_v19  ;;  %v742_v30 = vunpack.c.l.bf16 %v398_v20  ;;  %1138 = vmatprep.subr.mxu0 %v751_v22  ;;  %v491_v15 = vld [vmem:[%s2403_s11 + $0x5a8] sm:$0xff]  ;;  %v936_v19 = vunpack.c.l.bf16 %v495_v7  ;;  %v673_v22 = vunpack.c.h.bf16 %v363_v14 }
  0xb0   : > { %v394_v26 = vld [vmem:[%s2403_s11 + $0x2a0] sm:$0xff]  ;;  %v999_v29 = vunpack.c.h.bf16 %v526_v21  ;;  %v998_v31 = vunpack.c.l.bf16 %v526_v21  ;;  %1209 = vmatprep.subr.mxu1 %v1007_v23  ;;  %1139 = vmatpush2.msra.mxu0 %v750_v24  ;;  %v359_v20 = vld [vmem:[%s2403_s11 + $0x188] sm:$0xff]  ;;  %v929_v23 = vunpack.c.h.bf16 %v491_v15  ;;  %v672_v24 = vunpack.c.l.bf16 %v363_v14 }
  0xb1   : > { %v522_v27 = vld [vmem:[%s2403_s11 + $0x6a0] sm:$0xff]  ;;  %v735_v34 = vunpack.c.h.bf16 %v394_v26  ;;  %1210 = vmatpush2.msra.mxu1 %v1006_v25  ;;  %v734_v36 = vunpack.c.l.bf16 %v394_v26  ;;  %1140 = vmatprep.subr.mxu0 %v743_v28  ;;  %v487_v21 = vld [vmem:[%s2403_s11 + $0x588] sm:$0xff]  ;;  %v928_v25 = vunpack.c.l.bf16 %v491_v15  ;;  %v665_v28 = vunpack.c.h.bf16 %v359_v20 }
  0xb2   : > { %v390_v32 = vld [vmem:[%s2403_s11 + $0x280] sm:$0xff]  ;;  %v991_v35 = vunpack.c.h.bf16 %v522_v27  ;;  %v990_v37 = vunpack.c.l.bf16 %v522_v27  ;;  %1211 = vmatprep.subr.mxu1 %v999_v29  ;;  %1141 = vmatpush2.msra.mxu0 %v742_v30  ;;  %v355_v26 = vld [vmem:[%s2403_s11 + $0x168] sm:$0xff]  ;;  %v921_v29 = vunpack.c.h.bf16 %v487_v21  ;;  %v664_v30 = vunpack.c.l.bf16 %v359_v20 }
  0xb3   : > { %v518_v33 = vld [vmem:[%s2403_s11 + $0x680] sm:$0xff]  ;;  %v727_v40 = vunpack.c.h.bf16 %v390_v32  ;;  %1212 = vmatpush2.msra.mxu1 %v998_v31  ;;  %v726_v42 = vunpack.c.l.bf16 %v390_v32  ;;  %1142 = vmatprep.subr.mxu0 %v735_v34  ;;  %v483_v27 = vld [vmem:[%s2403_s11 + $0x568] sm:$0xff]  ;;  %v920_v31 = vunpack.c.l.bf16 %v487_v21  ;;  %v657_v34 = vunpack.c.h.bf16 %v355_v26 }
  0xb4   : > { %v386_v38 = vld [vmem:[%s2403_s11 + $0x260] sm:$0xff]  ;;  %v983_v41 = vunpack.c.h.bf16 %v518_v33  ;;  %v982_v43 = vunpack.c.l.bf16 %v518_v33  ;;  %1213 = vmatprep.subr.mxu1 %v991_v35  ;;  %1143 = vmatpush2.msra.mxu0 %v734_v36  ;;  %v351_v32 = vld [vmem:[%s2403_s11 + $0x148] sm:$0xff]  ;;  %v913_v35 = vunpack.c.h.bf16 %v483_v27  ;;  %v656_v36 = vunpack.c.l.bf16 %v355_v26 }
  0xb5   : > { %v514_v39 = vld [vmem:[%s2403_s11 + $0x660] sm:$0xff]  ;;  %v719_v46 = vunpack.c.h.bf16 %v386_v38  ;;  %1214 = vmatpush2.msra.mxu1 %v990_v37  ;;  %v718_v48 = vunpack.c.l.bf16 %v386_v38  ;;  %1144 = vmatprep.subr.mxu0 %v727_v40  ;;  %v479_v33 = vld [vmem:[%s2403_s11 + $0x548] sm:$0xff]  ;;  %v912_v37 = vunpack.c.l.bf16 %v483_v27  ;;  %v649_v40 = vunpack.c.h.bf16 %v351_v32 }
  0xb6   : > { %v382_v44 = vld [vmem:[%s2403_s11 + $0x240] sm:$0xff]  ;;  %v975_v47 = vunpack.c.h.bf16 %v514_v39  ;;  %v974_v49 = vunpack.c.l.bf16 %v514_v39  ;;  %1215 = vmatprep.subr.mxu1 %v983_v41  ;;  %1145 = vmatpush2.msra.mxu0 %v726_v42  ;;  %v347_v38 = vld [vmem:[%s2403_s11 + $0x128] sm:$0xff]  ;;  %v905_v41 = vunpack.c.h.bf16 %v479_v33  ;;  %v648_v42 = vunpack.c.l.bf16 %v351_v32 }
  0xb7   : > { %v510_v45 = vld [vmem:[%s2403_s11 + $0x640] sm:$0xff]  ;;  %v711_v52 = vunpack.c.h.bf16 %v382_v44  ;;  %1216 = vmatpush2.msra.mxu1 %v982_v43  ;;  %v710_v54 = vunpack.c.l.bf16 %v382_v44  ;;  %1146 = vmatprep.subr.mxu0 %v719_v46  ;;  %v475_v39 = vld [vmem:[%s2403_s11 + $0x528] sm:$0xff]  ;;  %v904_v43 = vunpack.c.l.bf16 %v479_v33  ;;  %v641_v46 = vunpack.c.h.bf16 %v347_v38 }
  0xb8   : > { %v378_v50 = vld [vmem:[%s2403_s11 + $0x220] sm:$0xff]  ;;  %v967_v53 = vunpack.c.h.bf16 %v510_v45  ;;  %v966_v55 = vunpack.c.l.bf16 %v510_v45  ;;  %1217 = vmatprep.subr.mxu1 %v975_v47  ;;  %1147 = vmatpush2.msra.mxu0 %v718_v48  ;;  %v343_v44 = vld [vmem:[%s2403_s11 + $0x108] sm:$0xff]  ;;  %v897_v47 = vunpack.c.h.bf16 %v475_v39  ;;  %v640_v48 = vunpack.c.l.bf16 %v347_v38 }
  0xb9   : > { %v506_v51 = vld [vmem:[%s2403_s11 + $0x620] sm:$0xff]  ;;  %v703_v58 = vunpack.c.h.bf16 %v378_v50  ;;  %1218 = vmatpush2.msra.mxu1 %v974_v49  ;;  %v702_v60 = vunpack.c.l.bf16 %v378_v50  ;;  %1148 = vmatprep.subr.mxu0 %v711_v52  ;;  %v471_v45 = vld [vmem:[%s2403_s11 + $0x508] sm:$0xff]  ;;  %v896_v49 = vunpack.c.l.bf16 %v475_v39  ;;  %v633_v52 = vunpack.c.h.bf16 %v343_v44 }
  0xba   : > { %v374_v56 = vld [vmem:[%s2403_s11 + $0x200] sm:$0xff]  ;;  %v959_v59 = vunpack.c.h.bf16 %v506_v51  ;;  %v958_v61 = vunpack.c.l.bf16 %v506_v51  ;;  %1219 = vmatprep.subr.mxu1 %v967_v53  ;;  %1149 = vmatpush2.msra.mxu0 %v710_v54  ;;  %v339_v50 = vld [vmem:[%s2403_s11 + $0xe8] sm:$0xff]  ;;  %v889_v53 = vunpack.c.h.bf16 %v471_v45  ;;  %v632_v54 = vunpack.c.l.bf16 %v343_v44 }
  0xbb   : > { %v502_v57 = vld [vmem:[%s2403_s11 + $0x600] sm:$0xff]  ;;  %v695_v62 = vunpack.c.h.bf16 %v374_v56  ;;  %1220 = vmatpush2.msra.mxu1 %v966_v55  ;;  %v694_v0 = vunpack.c.l.bf16 %v374_v56  ;;  %1150 = vmatprep.subr.mxu0 %v703_v58  ;;  %v467_v51 = vld [vmem:[%s2403_s11 + $0x4e8] sm:$0xff]  ;;  %v888_v55 = vunpack.c.l.bf16 %v471_v45  ;;  %v625_v58 = vunpack.c.h.bf16 %v339_v50 }
  0xbc   : > { %v951_v63 = vunpack.c.h.bf16 %v502_v57  ;;  %1221 = vmatprep.subr.mxu1 %v959_v59  ;;  %v950_v4 = vunpack.c.l.bf16 %v502_v57  ;;  %1151 = vmatpush2.msra.mxu0 %v702_v60  ;;  %v2494_v8 = vld [vmem:[%s2396_s13] sm:$0xff]  ;;  %v335_v56 = vld [vmem:[%s2403_s11 + $0xc8] sm:$0xff]  ;;  %v881_v59 = vunpack.c.h.bf16 %v467_v51  ;;  %v624_v60 = vunpack.c.l.bf16 %v339_v50 }
  0xbd   : > { %1222 = vmatpush2.msra.mxu1 %v958_v61  ;;  %1152 = vmatprep.subr.mxu0 %v695_v62  ;;  %v463_v57 = vld [vmem:[%s2403_s11 + $0x4c8] sm:$0xff]  ;;  %v880_v61 = vunpack.c.l.bf16 %v467_v51  ;;  %v616_v2 = vunpack.c.l.bf16 %v335_v56 }
  0xbe   : > { %1223 = vmatprep.subr.mxu1 %v951_v63  ;;  %1153 = vmatpush2.msra.mxu0 %v694_v0  ;;  %v331_v62 = vld [vmem:[%s2403_s11 + $0xa8] sm:$0xff]  ;;  %v617_v0 = vunpack.c.h.bf16 %v335_v56  ;;  %v873_v1 = vunpack.c.h.bf16 %v463_v57 }
  0xbf   : > { %1154 = vmatprep.mubr.f32.mxu0 %v2486_v3  ;;  %1224 = vmatpush2.msra.mxu1 %v950_v4  ;;  %v459_v63 = vld [vmem:[%s2403_s11 + $0x4a8] sm:$0xff]  ;;  %v872_v4 = vunpack.c.l.bf16 %v463_v57 }
  0xc0   : > { %1225 = vmatprep.mubr.f32.mxu1 %v2489_v5  ;;  %1155 = vmatmul.mubr.f32.vlgmr.msra.gmra.mxu0 %v2494_v8  ;;  %v327_v6 = vld [vmem:[%s2403_s11 + $0x88] sm:$0xff] }
  0xc1   : > { %1226 = vmatmul.mubr.f32.vlgmr.msra.gmra.mxu1 %v2497_v9  ;;  %1232 = vmatprep.subr.mxu0 %v689_v10  ;;  %v455_v7 = vld [vmem:[%s2403_s11 + $0x488] sm:$0xff]  ;;  %v609_v10 = vunpack.c.h.bf16 %v331_v62 }
  0xc2   : > { %1303 = vmatprep.subr.mxu1 %v945_v11  ;;  %1233 = vmatpush1.msra.mxu0 %v688_v12  ;;  %v865_v11 = vunpack.c.h.bf16 %v459_v63  ;;  %v608_v12 = vunpack.c.l.bf16 %v331_v62  ;;  %v323_v14 = vld [vmem:[%s2403_s11 + $0x68] sm:$0xff] }
  0xc3   : > { %1304 = vmatpush1.msra.mxu1 %v944_v13  ;;  %1234 = vmatprep.subr.mxu0 %v681_v16  ;;  %v864_v13 = vunpack.c.l.bf16 %v459_v63  ;;  %v451_v15 = vld [vmem:[%s2403_s11 + $0x468] sm:$0xff]  ;;  %v601_v16 = vunpack.c.h.bf16 %v327_v6 }
  0xc4   : > { %1305 = vmatprep.subr.mxu1 %v937_v17  ;;  %1235 = vmatpush1.msra.mxu0 %v680_v18  ;;  %v857_v17 = vunpack.c.h.bf16 %v455_v7  ;;  %v600_v18 = vunpack.c.l.bf16 %v327_v6  ;;  %v319_v20 = vld [vmem:[%s2403_s11 + $0x48] sm:$0xff] }
  0xc5   : > { %1306 = vmatpush1.msra.mxu1 %v936_v19  ;;  %1236 = vmatprep.subr.mxu0 %v673_v22  ;;  %v856_v19 = vunpack.c.l.bf16 %v455_v7  ;;  %v447_v21 = vld [vmem:[%s2403_s11 + $0x448] sm:$0xff]  ;;  %v593_v22 = vunpack.c.h.bf16 %v323_v14 }
  0xc6   : > { %1307 = vmatprep.subr.mxu1 %v929_v23  ;;  %1237 = vmatpush1.msra.mxu0 %v672_v24  ;;  %v849_v23 = vunpack.c.h.bf16 %v451_v15  ;;  %v592_v24 = vunpack.c.l.bf16 %v323_v14  ;;  %v315_v26 = vld [vmem:[%s2403_s11 + $0x28] sm:$0xff] }
  0xc7   : > { %1308 = vmatpush1.msra.mxu1 %v928_v25  ;;  %1238 = vmatprep.subr.mxu0 %v665_v28  ;;  %v848_v25 = vunpack.c.l.bf16 %v451_v15  ;;  %v443_v27 = vld [vmem:[%s2403_s11 + $0x428] sm:$0xff]  ;;  %v585_v28 = vunpack.c.h.bf16 %v319_v20 }
  0xc8   : > { %1309 = vmatprep.subr.mxu1 %v921_v29  ;;  %1239 = vmatpush1.msra.mxu0 %v664_v30  ;;  %v841_v29 = vunpack.c.h.bf16 %v447_v21  ;;  %v584_v30 = vunpack.c.l.bf16 %v319_v20  ;;  %v311_v32 = vld [vmem:[%s2403_s11 + $0x8] sm:$0xff] }
  0xc9   : > { %1310 = vmatpush1.msra.mxu1 %v920_v31  ;;  %1240 = vmatprep.subr.mxu0 %v657_v34  ;;  %v840_v31 = vunpack.c.l.bf16 %v447_v21  ;;  %v439_v33 = vld [vmem:[%s2403_s11 + $0x408] sm:$0xff]  ;;  %v577_v34 = vunpack.c.h.bf16 %v315_v26 }
  0xca   : > { %1311 = vmatprep.subr.mxu1 %v913_v35  ;;  %1241 = vmatpush1.msra.mxu0 %v656_v36  ;;  %v833_v35 = vunpack.c.h.bf16 %v443_v27  ;;  %v576_v36 = vunpack.c.l.bf16 %v315_v26  ;;  %v435_v38 = vld [vmem:[%s2403_s11 + $0x3e8] sm:$0xff] }
  0xcb   : > { %1312 = vmatpush1.msra.mxu1 %v912_v37  ;;  %1242 = vmatprep.subr.mxu0 %v649_v40  ;;  %v832_v37 = vunpack.c.l.bf16 %v443_v27  ;;  %v563_v39 = vld [vmem:[%s2403_s11 + $0x7e8] sm:$0xff]  ;;  %v569_v40 = vunpack.c.h.bf16 %v311_v32 }
  0xcc   : > { %1313 = vmatprep.subr.mxu1 %v905_v41  ;;  %1243 = vmatpush1.msra.mxu0 %v648_v42  ;;  %v825_v41 = vunpack.c.h.bf16 %v439_v33  ;;  %v568_v42 = vunpack.c.l.bf16 %v311_v32  ;;  %v431_v44 = vld [vmem:[%s2403_s11 + $0x3c8] sm:$0xff] }
  0xcd   : > { %1314 = vmatpush1.msra.mxu1 %v904_v43  ;;  %1244 = vmatprep.subr.mxu0 %v641_v46  ;;  %v824_v43 = vunpack.c.l.bf16 %v439_v33  ;;  %v559_v45 = vld [vmem:[%s2403_s11 + $0x7c8] sm:$0xff]  ;;  %v817_v46 = vunpack.c.h.bf16 %v435_v38 }
  0xce   : > { %1315 = vmatprep.subr.mxu1 %v897_v47  ;;  %1245 = vmatpush1.msra.mxu0 %v640_v48  ;;  %v1073_v47 = vunpack.c.h.bf16 %v563_v39  ;;  %v816_v48 = vunpack.c.l.bf16 %v435_v38  ;;  %v427_v50 = vld [vmem:[%s2403_s11 + $0x3a8] sm:$0xff] }
  0xcf   : > { %1316 = vmatpush1.msra.mxu1 %v896_v49  ;;  %1246 = vmatprep.subr.mxu0 %v633_v52  ;;  %v1072_v49 = vunpack.c.l.bf16 %v563_v39  ;;  %v555_v51 = vld [vmem:[%s2403_s11 + $0x7a8] sm:$0xff]  ;;  %v809_v52 = vunpack.c.h.bf16 %v431_v44 }
  0xd0   : > { %1317 = vmatprep.subr.mxu1 %v889_v53  ;;  %1247 = vmatpush1.msra.mxu0 %v632_v54  ;;  %v1065_v53 = vunpack.c.h.bf16 %v559_v45  ;;  %v808_v54 = vunpack.c.l.bf16 %v431_v44  ;;  %v423_v56 = vld [vmem:[%s2403_s11 + $0x388] sm:$0xff] }
  0xd1   : > { %1318 = vmatpush1.msra.mxu1 %v888_v55  ;;  %1248 = vmatprep.subr.mxu0 %v625_v58  ;;  %v1064_v55 = vunpack.c.l.bf16 %v559_v45  ;;  %v551_v57 = vld [vmem:[%s2403_s11 + $0x788] sm:$0xff]  ;;  %v801_v58 = vunpack.c.h.bf16 %v427_v50 }
  0xd2   : > { %1319 = vmatprep.subr.mxu1 %v881_v59  ;;  %1249 = vmatpush1.msra.mxu0 %v624_v60  ;;  %v1057_v59 = vunpack.c.h.bf16 %v555_v51  ;;  %v800_v60 = vunpack.c.l.bf16 %v427_v50  ;;  %v419_v62 = vld [vmem:[%s2403_s11 + $0x368] sm:$0xff] }
  0xd3   : > { %1320 = vmatpush1.msra.mxu1 %v880_v61  ;;  %1250 = vmatprep.subr.mxu0 %v617_v0  ;;  %v1056_v61 = vunpack.c.l.bf16 %v555_v51  ;;  %v547_v63 = vld [vmem:[%s2403_s11 + $0x768] sm:$0xff]  ;;  %v793_v0 = vunpack.c.h.bf16 %v423_v56 }
  0xd4   : > { %1321 = vmatprep.subr.mxu1 %v873_v1  ;;  %1251 = vmatpush1.msra.mxu0 %v616_v2  ;;  %v1049_v1 = vunpack.c.h.bf16 %v551_v57  ;;  %v792_v2 = vunpack.c.l.bf16 %v423_v56  ;;  %v415_v6 = vld [vmem:[%s2403_s11 + $0x348] sm:$0xff] }
  0xd5   : > { %1322 = vmatpush1.msra.mxu1 %v872_v4  ;;  %1252 = vmatprep.subr.mxu0 %v609_v10  ;;  %v1048_v4 = vunpack.c.l.bf16 %v551_v57  ;;  %v543_v7 = vld [vmem:[%s2403_s11 + $0x748] sm:$0xff]  ;;  %v785_v10 = vunpack.c.h.bf16 %v419_v62 }
  0xd6   : > { %1323 = vmatprep.subr.mxu1 %v865_v11  ;;  %1253 = vmatpush1.msra.mxu0 %v608_v12  ;;  %v1041_v11 = vunpack.c.h.bf16 %v547_v63  ;;  %v784_v12 = vunpack.c.l.bf16 %v419_v62  ;;  %v411_v14 = vld [vmem:[%s2403_s11 + $0x328] sm:$0xff] }
  0xd7   : > { %1324 = vmatpush1.msra.mxu1 %v864_v13  ;;  %1254 = vmatprep.subr.mxu0 %v601_v16  ;;  %v1040_v13 = vunpack.c.l.bf16 %v547_v63  ;;  %v539_v15 = vld [vmem:[%s2403_s11 + $0x728] sm:$0xff]  ;;  %v777_v16 = vunpack.c.h.bf16 %v415_v6 }
  0xd8   : > { %1325 = vmatprep.subr.mxu1 %v857_v17  ;;  %1255 = vmatpush1.msra.mxu0 %v600_v18  ;;  %v1033_v17 = vunpack.c.h.bf16 %v543_v7  ;;  %v776_v18 = vunpack.c.l.bf16 %v415_v6  ;;  %v407_v20 = vld [vmem:[%s2403_s11 + $0x308] sm:$0xff] }
  0xd9   : > { %1326 = vmatpush1.msra.mxu1 %v856_v19  ;;  %1256 = vmatprep.subr.mxu0 %v593_v22  ;;  %v1032_v19 = vunpack.c.l.bf16 %v543_v7  ;;  %v535_v21 = vld [vmem:[%s2403_s11 + $0x708] sm:$0xff]  ;;  %v769_v22 = vunpack.c.h.bf16 %v411_v14 }
  0xda   : > { %1327 = vmatprep.subr.mxu1 %v849_v23  ;;  %1257 = vmatpush1.msra.mxu0 %v592_v24  ;;  %v1025_v23 = vunpack.c.h.bf16 %v539_v15  ;;  %v768_v24 = vunpack.c.l.bf16 %v411_v14  ;;  %v403_v26 = vld [vmem:[%s2403_s11 + $0x2e8] sm:$0xff] }
  0xdb   : > { %1328 = vmatpush1.msra.mxu1 %v848_v25  ;;  %1258 = vmatprep.subr.mxu0 %v585_v28  ;;  %v1024_v25 = vunpack.c.l.bf16 %v539_v15  ;;  %v531_v27 = vld [vmem:[%s2403_s11 + $0x6e8] sm:$0xff]  ;;  %v761_v28 = vunpack.c.h.bf16 %v407_v20 }
  0xdc   : > { %1329 = vmatprep.subr.mxu1 %v841_v29  ;;  %1259 = vmatpush1.msra.mxu0 %v584_v30  ;;  %v1017_v29 = vunpack.c.h.bf16 %v535_v21  ;;  %v760_v30 = vunpack.c.l.bf16 %v407_v20  ;;  %v399_v32 = vld [vmem:[%s2403_s11 + $0x2c8] sm:$0xff]  ;;  %v368_v20 = vld [vmem:[%s2403_s11 + $0x1d0] sm:$0xff] }
  0xdd   : > { %1330 = vmatpush1.msra.mxu1 %v840_v31  ;;  %1260 = vmatprep.subr.mxu0 %v577_v34  ;;  %v1016_v31 = vunpack.c.l.bf16 %v535_v21  ;;  %v527_v33 = vld [vmem:[%s2403_s11 + $0x6c8] sm:$0xff]  ;;  %v753_v34 = vunpack.c.h.bf16 %v403_v26  ;;  %v496_v21 = vld [vmem:[%s2403_s11 + $0x5d0] sm:$0xff] }
  0xde   : > { %1331 = vmatprep.subr.mxu1 %v833_v35  ;;  %1261 = vmatpush1.msra.mxu0 %v576_v36  ;;  %v1009_v35 = vunpack.c.h.bf16 %v531_v27  ;;  %v752_v36 = vunpack.c.l.bf16 %v403_v26  ;;  %v395_v38 = vld [vmem:[%s2403_s11 + $0x2a8] sm:$0xff]  ;;  %v364_v26 = vld [vmem:[%s2403_s11 + $0x1b0] sm:$0xff] }
  0xdf   : > { %1332 = vmatpush1.msra.mxu1 %v832_v37  ;;  %1262 = vmatprep.subr.mxu0 %v569_v40  ;;  %v1008_v37 = vunpack.c.l.bf16 %v531_v27  ;;  %v523_v39 = vld [vmem:[%s2403_s11 + $0x6a8] sm:$0xff]  ;;  %v745_v40 = vunpack.c.h.bf16 %v399_v32  ;;  %v492_v27 = vld [vmem:[%s2403_s11 + $0x5b0] sm:$0xff] }
  0xe0   : > { %1333 = vmatprep.subr.mxu1 %v825_v41  ;;  %1263 = vmatpush1.msra.mxu0 %v568_v42  ;;  %v1001_v41 = vunpack.c.h.bf16 %v527_v33  ;;  %v744_v42 = vunpack.c.l.bf16 %v399_v32  ;;  %v391_v44 = vld [vmem:[%s2403_s11 + $0x288] sm:$0xff]  ;;  %v360_v32 = vld [vmem:[%s2403_s11 + $0x190] sm:$0xff] }
  0xe1   : > { %1334 = vmatpush1.msra.mxu1 %v824_v43  ;;  %1264 = vmatprep.subr.mxu0 %v817_v46  ;;  %v1000_v43 = vunpack.c.l.bf16 %v527_v33  ;;  %v519_v45 = vld [vmem:[%s2403_s11 + $0x688] sm:$0xff]  ;;  %v737_v46 = vunpack.c.h.bf16 %v395_v38  ;;  %v488_v33 = vld [vmem:[%s2403_s11 + $0x590] sm:$0xff] }
  0xe2   : > { %1335 = vmatprep.subr.mxu1 %v1073_v47  ;;  %1265 = vmatpush2.msra.mxu0 %v816_v48  ;;  %v993_v47 = vunpack.c.h.bf16 %v523_v39  ;;  %v736_v48 = vunpack.c.l.bf16 %v395_v38  ;;  %v387_v50 = vld [vmem:[%s2403_s11 + $0x268] sm:$0xff]  ;;  %v666_v38 = vunpack.c.l.bf16 %v360_v32 }
  0xe3   : > { %1336 = vmatpush2.msra.mxu1 %v1072_v49  ;;  %1266 = vmatprep.subr.mxu0 %v809_v52  ;;  %v992_v49 = vunpack.c.l.bf16 %v523_v39  ;;  %v515_v51 = vld [vmem:[%s2403_s11 + $0x668] sm:$0xff]  ;;  %v729_v52 = vunpack.c.h.bf16 %v391_v44  ;;  %v922_v39 = vunpack.c.l.bf16 %v488_v33 }
  0xe4   : > { %1337 = vmatprep.subr.mxu1 %v1065_v53  ;;  %1267 = vmatpush2.msra.mxu0 %v808_v54  ;;  %v985_v53 = vunpack.c.h.bf16 %v519_v45  ;;  %v728_v54 = vunpack.c.l.bf16 %v391_v44  ;;  %v383_v56 = vld [vmem:[%s2403_s11 + $0x248] sm:$0xff] }
  0xe5   : > { %1338 = vmatpush2.msra.mxu1 %v1064_v55  ;;  %1268 = vmatprep.subr.mxu0 %v801_v58  ;;  %v984_v55 = vunpack.c.l.bf16 %v519_v45  ;;  %v511_v57 = vld [vmem:[%s2403_s11 + $0x648] sm:$0xff]  ;;  %v721_v58 = vunpack.c.h.bf16 %v387_v50 }
  0xe6   : > { %1339 = vmatprep.subr.mxu1 %v1057_v59  ;;  %1269 = vmatpush2.msra.mxu0 %v800_v60  ;;  %v977_v59 = vunpack.c.h.bf16 %v515_v51  ;;  %v720_v60 = vunpack.c.l.bf16 %v387_v50  ;;  %v379_v62 = vld [vmem:[%s2403_s11 + $0x228] sm:$0xff] }
  0xe7   : > { %1340 = vmatpush2.msra.mxu1 %v1056_v61  ;;  %1270 = vmatprep.subr.mxu0 %v793_v0  ;;  %v976_v61 = vunpack.c.l.bf16 %v515_v51  ;;  %v507_v63 = vld [vmem:[%s2403_s11 + $0x628] sm:$0xff]  ;;  %v713_v0 = vunpack.c.h.bf16 %v383_v56 }
  0xe8   : > { %1341 = vmatprep.subr.mxu1 %v1049_v1  ;;  %1271 = vmatpush2.msra.mxu0 %v792_v2  ;;  %v969_v1 = vunpack.c.h.bf16 %v511_v57  ;;  %v712_v2 = vunpack.c.l.bf16 %v383_v56  ;;  %v375_v6 = vld [vmem:[%s2403_s11 + $0x208] sm:$0xff] }
  0xe9   : > { %1342 = vmatpush2.msra.mxu1 %v1048_v4  ;;  %1272 = vmatprep.subr.mxu0 %v785_v10  ;;  %v968_v4 = vunpack.c.l.bf16 %v511_v57  ;;  %v503_v7 = vld [vmem:[%s2403_s11 + $0x608] sm:$0xff]  ;;  %v705_v10 = vunpack.c.h.bf16 %v379_v62  ;;  %v697_v14 = vunpack.c.h.bf16 %v375_v6 }
  0xea   : > { %1343 = vmatprep.subr.mxu1 %v1041_v11  ;;  %1273 = vmatpush2.msra.mxu0 %v784_v12  ;;  %v961_v11 = vunpack.c.h.bf16 %v507_v63  ;;  %v704_v12 = vunpack.c.l.bf16 %v379_v62  ;;  %v953_v15 = vunpack.c.h.bf16 %v503_v7 }
  0xeb   : > { %1344 = vmatpush2.msra.mxu1 %v1040_v13  ;;  %1274 = vmatprep.subr.mxu0 %v777_v16  ;;  %v960_v13 = vunpack.c.l.bf16 %v507_v63  ;;  %v696_v16 = vunpack.c.l.bf16 %v375_v6 }
  0xec   : > { %1345 = vmatprep.subr.mxu1 %v1033_v17  ;;  %1275 = vmatpush2.msra.mxu0 %v776_v18  ;;  %v372_v17 = vld [vmem:[%s2403_s11 + $0x1f0] sm:$0xff] }
  0xed   : > { %1346 = vmatpush2.msra.mxu1 %v1032_v19  ;;  %1276 = vmatprep.subr.mxu0 %v769_v22  ;;  %v500_v18 = vld [vmem:[%s2403_s11 + $0x5f0] sm:$0xff]  ;;  %v952_v19 = vunpack.c.l.bf16 %v503_v7  ;;  %v691_v22 = vunpack.c.h.bf16 %v372_v17 }
  0xee   : > { %1347 = vmatprep.subr.mxu1 %v1025_v23  ;;  %1277 = vmatpush2.msra.mxu0 %v768_v24  ;;  %v947_v23 = vunpack.c.h.bf16 %v500_v18  ;;  %v690_v24 = vunpack.c.l.bf16 %v372_v17  ;;  %v456_v17 = vld [vmem:[%s2403_s11 + $0x490] sm:$0xff] }
  0xef   : > { %1348 = vmatpush2.msra.mxu1 %v1024_v25  ;;  %1278 = vmatprep.subr.mxu0 %v761_v28  ;;  %v946_v25 = vunpack.c.l.bf16 %v500_v18  ;;  %v683_v28 = vunpack.c.h.bf16 %v368_v20 }
  0xf0   : > { %1349 = vmatprep.subr.mxu1 %v1017_v29  ;;  %1279 = vmatpush2.msra.mxu0 %v760_v30  ;;  %v939_v29 = vunpack.c.h.bf16 %v496_v21  ;;  %v682_v30 = vunpack.c.l.bf16 %v368_v20 }
  0xf1   : > { %1350 = vmatpush2.msra.mxu1 %v1016_v31  ;;  %1280 = vmatprep.subr.mxu0 %v753_v34  ;;  %v938_v31 = vunpack.c.l.bf16 %v496_v21  ;;  %v931_v34 = vunpack.c.h.bf16 %v492_v27 }
  0xf2   : > { %1351 = vmatprep.subr.mxu1 %v1009_v35  ;;  %1281 = vmatpush2.msra.mxu0 %v752_v36  ;;  %v930_v35 = vunpack.c.l.bf16 %v492_v27  ;;  %v356_v36 = vld [vmem:[%s2403_s11 + $0x170] sm:$0xff]  ;;  %v858_v27 = vunpack.c.l.bf16 %v456_v17 }
  0xf3   : > { %1352 = vmatpush2.msra.mxu1 %v1008_v37  ;;  %1282 = vmatprep.subr.mxu0 %v745_v40  ;;  %v484_v37 = vld [vmem:[%s2403_s11 + $0x570] sm:$0xff]  ;;  %v658_v44 = vunpack.c.l.bf16 %v356_v36 }
  0xf4   : > { %1353 = vmatprep.subr.mxu1 %v1001_v41  ;;  %1283 = vmatpush2.msra.mxu0 %v744_v42  ;;  %v352_v40 = vld [vmem:[%s2403_s11 + $0x150] sm:$0xff]  ;;  %v659_v42 = vunpack.c.h.bf16 %v356_v36  ;;  %v914_v45 = vunpack.c.l.bf16 %v484_v37 }
  0xf5   : > { %1354 = vmatpush2.msra.mxu1 %v1000_v43  ;;  %1284 = vmatprep.subr.mxu0 %v737_v46  ;;  %v480_v41 = vld [vmem:[%s2403_s11 + $0x550] sm:$0xff]  ;;  %v915_v43 = vunpack.c.h.bf16 %v484_v37  ;;  %v650_v50 = vunpack.c.l.bf16 %v352_v40 }
  0xf6   : > { %1355 = vmatprep.subr.mxu1 %v993_v47  ;;  %1285 = vmatpush2.msra.mxu0 %v736_v48  ;;  %v348_v46 = vld [vmem:[%s2403_s11 + $0x130] sm:$0xff]  ;;  %v651_v48 = vunpack.c.h.bf16 %v352_v40  ;;  %v906_v51 = vunpack.c.l.bf16 %v480_v41 }
  0xf7   : > { %1356 = vmatpush2.msra.mxu1 %v992_v49  ;;  %1286 = vmatprep.subr.mxu0 %v729_v52  ;;  %v476_v47 = vld [vmem:[%s2403_s11 + $0x530] sm:$0xff]  ;;  %v907_v49 = vunpack.c.h.bf16 %v480_v41  ;;  %v642_v56 = vunpack.c.l.bf16 %v348_v46 }
  0xf8   : > { %1357 = vmatprep.subr.mxu1 %v985_v53  ;;  %1287 = vmatpush2.msra.mxu0 %v728_v54  ;;  %v344_v52 = vld [vmem:[%s2403_s11 + $0x110] sm:$0xff]  ;;  %v643_v54 = vunpack.c.h.bf16 %v348_v46  ;;  %v898_v57 = vunpack.c.l.bf16 %v476_v47 }
  0xf9   : > { %1358 = vmatpush2.msra.mxu1 %v984_v55  ;;  %1288 = vmatprep.subr.mxu0 %v721_v58  ;;  %v472_v53 = vld [vmem:[%s2403_s11 + $0x510] sm:$0xff]  ;;  %v899_v55 = vunpack.c.h.bf16 %v476_v47  ;;  %v634_v62 = vunpack.c.l.bf16 %v344_v52 }
  0xfa   : > { %1359 = vmatprep.subr.mxu1 %v977_v59  ;;  %1289 = vmatpush2.msra.mxu0 %v720_v60  ;;  %v340_v58 = vld [vmem:[%s2403_s11 + $0xf0] sm:$0xff]  ;;  %v635_v60 = vunpack.c.h.bf16 %v344_v52  ;;  %v890_v63 = vunpack.c.l.bf16 %v472_v53 }
  0xfb   : > { %1360 = vmatpush2.msra.mxu1 %v976_v61  ;;  %1290 = vmatprep.subr.mxu0 %v713_v0  ;;  %v468_v59 = vld [vmem:[%s2403_s11 + $0x4f0] sm:$0xff]  ;;  %v891_v61 = vunpack.c.h.bf16 %v472_v53  ;;  %v626_v6 = vunpack.c.l.bf16 %v340_v58 }
  0xfc   : > { %1361 = vmatprep.subr.mxu1 %v969_v1  ;;  %1291 = vmatpush2.msra.mxu0 %v712_v2  ;;  %v336_v0 = vld [vmem:[%s2403_s11 + $0xd0] sm:$0xff]  ;;  %v627_v2 = vunpack.c.h.bf16 %v340_v58  ;;  %v882_v7 = vunpack.c.l.bf16 %v468_v59 }
  0xfd   : > { %1362 = vmatpush2.msra.mxu1 %v968_v4  ;;  %1292 = vmatprep.subr.mxu0 %v705_v10  ;;  %v464_v1 = vld [vmem:[%s2403_s11 + $0x4d0] sm:$0xff]  ;;  %v883_v4 = vunpack.c.h.bf16 %v468_v59 }
  0xfe   : > { %1363 = vmatprep.subr.mxu1 %v961_v11  ;;  %1293 = vmatpush2.msra.mxu0 %v704_v12  ;;  %v332_v10 = vld [vmem:[%s2403_s11 + $0xb0] sm:$0xff]  ;;  %v619_v12 = vunpack.c.h.bf16 %v336_v0 }
  0xff   : > { %1364 = vmatpush2.msra.mxu1 %v960_v13  ;;  %1294 = vmatprep.subr.mxu0 %v697_v14  ;;  %v460_v11 = vld [vmem:[%s2403_s11 + $0x4b0] sm:$0xff]  ;;  %v875_v13 = vunpack.c.h.bf16 %v464_v1  ;;  %v618_v14 = vunpack.c.l.bf16 %v336_v0  ;;  %v611_v18 = vunpack.c.h.bf16 %v332_v10  ;;  %v610_v20 = vunpack.c.l.bf16 %v332_v10 }
 0x100   : > { %1365 = vmatprep.subr.mxu1 %v953_v15  ;;  %1295 = vmatpush2.msra.mxu0 %v696_v16  ;;  %v874_v15 = vunpack.c.l.bf16 %v464_v1  ;;  %v328_v16 = vld [vmem:[%s2403_s11 + $0x90] sm:$0xff]  ;;  %v866_v21 = vunpack.c.l.bf16 %v460_v11 }
 0x101   : > { %1296 = vmatprep.mubr.f32.mxu0 %v2486_v3  ;;  %1366 = vmatpush2.msra.mxu1 %v952_v19  ;;  %v675_v3 = vunpack.c.h.bf16 %v364_v26  ;;  %v867_v19 = vunpack.c.h.bf16 %v460_v11 }
 0x102   : > { %1367 = vmatprep.mubr.f32.mxu1 %v2489_v5  ;;  %1297 = vmatmul.mubr.f32.vlgmr.msra.gmra.mxu0 %v2494_v8  ;;  %v674_v5 = vunpack.c.l.bf16 %v364_v26  ;;  %v667_v8 = vunpack.c.h.bf16 %v360_v32  ;;  %v602_v26 = vunpack.c.l.bf16 %v328_v16 }
 0x103   : > { %1368 = vmatmul.mubr.f32.vlgmr.msra.gmra.mxu1 %v2497_v9  ;;  %1374 = vmatprep.subr.mxu0 %v691_v22  ;;  %v923_v9 = vunpack.c.h.bf16 %v488_v33  ;;  %v324_v22 = vld [vmem:[%s2403_s11 + $0x70] sm:$0xff] }
 0x104   : > { %1445 = vmatprep.subr.mxu1 %v947_v23  ;;  %1375 = vmatpush1.msra.mxu0 %v690_v24  ;;  %v452_v23 = vld [vmem:[%s2403_s11 + $0x470] sm:$0xff]  ;;  %v603_v24 = vunpack.c.h.bf16 %v328_v16  ;;  %v594_v32 = vunpack.c.l.bf16 %v324_v22 }
 0x105   : > { %1446 = vmatpush1.msra.mxu1 %v946_v25  ;;  %1376 = vmatprep.subr.mxu0 %v683_v28  ;;  %v859_v25 = vunpack.c.h.bf16 %v456_v17  ;;  %v320_v28 = vld [vmem:[%s2403_s11 + $0x50] sm:$0xff]  ;;  %v850_v33 = vunpack.c.l.bf16 %v452_v23 }
 0x106   : > { %1447 = vmatprep.subr.mxu1 %v939_v29  ;;  %1377 = vmatpush1.msra.mxu0 %v682_v30  ;;  %v448_v29 = vld [vmem:[%s2403_s11 + $0x450] sm:$0xff]  ;;  %v595_v30 = vunpack.c.h.bf16 %v324_v22  ;;  %v586_v36 = vunpack.c.l.bf16 %v320_v28 }
 0x107   : > { %1448 = vmatpush1.msra.mxu1 %v938_v31  ;;  %1378 = vmatprep.subr.mxu0 %v675_v3  ;;  %v851_v31 = vunpack.c.h.bf16 %v452_v23  ;;  %v316_v3 = vld [vmem:[%s2403_s11 + $0x30] sm:$0xff]  ;;  %v842_v37 = vunpack.c.l.bf16 %v448_v29 }
 0x108   : > { %1449 = vmatprep.subr.mxu1 %v931_v34  ;;  %1379 = vmatpush1.msra.mxu0 %v674_v5  ;;  %v444_v34 = vld [vmem:[%s2403_s11 + $0x430] sm:$0xff]  ;;  %v587_v5 = vunpack.c.h.bf16 %v320_v28  ;;  %v578_v40 = vunpack.c.l.bf16 %v316_v3 }
 0x109   : > { %1450 = vmatpush1.msra.mxu1 %v930_v35  ;;  %1380 = vmatprep.subr.mxu0 %v667_v8  ;;  %v843_v35 = vunpack.c.h.bf16 %v448_v29  ;;  %v312_v8 = vld [vmem:[%s2403_s11 + $0x10] sm:$0xff]  ;;  %v834_v41 = vunpack.c.l.bf16 %v444_v34 }
 0x10a   : > { %1451 = vmatprep.subr.mxu1 %v923_v9  ;;  %1381 = vmatpush1.msra.mxu0 %v666_v38  ;;  %v440_v9 = vld [vmem:[%s2403_s11 + $0x410] sm:$0xff]  ;;  %v579_v38 = vunpack.c.h.bf16 %v316_v3  ;;  %v570_v46 = vunpack.c.l.bf16 %v312_v8 }
 0x10b   : > { %1452 = vmatpush1.msra.mxu1 %v922_v39  ;;  %1382 = vmatprep.subr.mxu0 %v659_v42  ;;  %v835_v39 = vunpack.c.h.bf16 %v444_v34  ;;  %v436_v42 = vld [vmem:[%s2403_s11 + $0x3f0] sm:$0xff]  ;;  %v826_v47 = vunpack.c.l.bf16 %v440_v9 }
 0x10c   : > { %1453 = vmatprep.subr.mxu1 %v915_v43  ;;  %1383 = vmatpush1.msra.mxu0 %v658_v44  ;;  %v564_v43 = vld [vmem:[%s2403_s11 + $0x7f0] sm:$0xff]  ;;  %v571_v44 = vunpack.c.h.bf16 %v312_v8  ;;  %v818_v52 = vunpack.c.l.bf16 %v436_v42 }
 0x10d   : > { %1454 = vmatpush1.msra.mxu1 %v914_v45  ;;  %1384 = vmatprep.subr.mxu0 %v651_v48  ;;  %v827_v45 = vunpack.c.h.bf16 %v440_v9  ;;  %v432_v48 = vld [vmem:[%s2403_s11 + $0x3d0] sm:$0xff]  ;;  %v1074_v53 = vunpack.c.l.bf16 %v564_v43 }
 0x10e   : > { %1455 = vmatprep.subr.mxu1 %v907_v49  ;;  %1385 = vmatpush1.msra.mxu0 %v650_v50  ;;  %v560_v49 = vld [vmem:[%s2403_s11 + $0x7d0] sm:$0xff]  ;;  %v819_v50 = vunpack.c.h.bf16 %v436_v42  ;;  %v810_v58 = vunpack.c.l.bf16 %v432_v48 }
 0x10f   : > { %1456 = vmatpush1.msra.mxu1 %v906_v51  ;;  %1386 = vmatprep.subr.mxu0 %v643_v54  ;;  %v1075_v51 = vunpack.c.h.bf16 %v564_v43  ;;  %v428_v54 = vld [vmem:[%s2403_s11 + $0x3b0] sm:$0xff]  ;;  %v1066_v59 = vunpack.c.l.bf16 %v560_v49 }
 0x110   : > { %1457 = vmatprep.subr.mxu1 %v899_v55  ;;  %1387 = vmatpush1.msra.mxu0 %v642_v56  ;;  %v556_v55 = vld [vmem:[%s2403_s11 + $0x7b0] sm:$0xff]  ;;  %v811_v56 = vunpack.c.h.bf16 %v432_v48  ;;  %v802_v0 = vunpack.c.l.bf16 %v428_v54 }
 0x111   : > { %1458 = vmatpush1.msra.mxu1 %v898_v57  ;;  %1388 = vmatprep.subr.mxu0 %v635_v60  ;;  %v1067_v57 = vunpack.c.h.bf16 %v560_v49  ;;  %v424_v60 = vld [vmem:[%s2403_s11 + $0x390] sm:$0xff]  ;;  %v1058_v1 = vunpack.c.l.bf16 %v556_v55 }
 0x112   : > { %1459 = vmatprep.subr.mxu1 %v891_v61  ;;  %1389 = vmatpush1.msra.mxu0 %v634_v62  ;;  %v552_v61 = vld [vmem:[%s2403_s11 + $0x790] sm:$0xff]  ;;  %v803_v62 = vunpack.c.h.bf16 %v428_v54  ;;  %v794_v10 = vunpack.c.l.bf16 %v424_v60 }
 0x113   : > { %1460 = vmatpush1.msra.mxu1 %v890_v63  ;;  %1390 = vmatprep.subr.mxu0 %v627_v2  ;;  %v1059_v63 = vunpack.c.h.bf16 %v556_v55  ;;  %v420_v2 = vld [vmem:[%s2403_s11 + $0x370] sm:$0xff]  ;;  %v1050_v11 = vunpack.c.l.bf16 %v552_v61 }
 0x114   : > { %1461 = vmatprep.subr.mxu1 %v883_v4  ;;  %1391 = vmatpush1.msra.mxu0 %v626_v6  ;;  %v548_v4 = vld [vmem:[%s2403_s11 + $0x770] sm:$0xff]  ;;  %v795_v6 = vunpack.c.h.bf16 %v424_v60  ;;  %v786_v16 = vunpack.c.l.bf16 %v420_v2 }
 0x115   : > { %1462 = vmatpush1.msra.mxu1 %v882_v7  ;;  %1392 = vmatprep.subr.mxu0 %v619_v12  ;;  %v1051_v7 = vunpack.c.h.bf16 %v552_v61  ;;  %v416_v12 = vld [vmem:[%s2403_s11 + $0x350] sm:$0xff]  ;;  %v1042_v17 = vunpack.c.l.bf16 %v548_v4 }
 0x116   : > { %1463 = vmatprep.subr.mxu1 %v875_v13  ;;  %1393 = vmatpush1.msra.mxu0 %v618_v14  ;;  %v544_v13 = vld [vmem:[%s2403_s11 + $0x750] sm:$0xff]  ;;  %v787_v14 = vunpack.c.h.bf16 %v420_v2  ;;  %v778_v22 = vunpack.c.l.bf16 %v416_v12 }
 0x117   : > { %1464 = vmatpush1.msra.mxu1 %v874_v15  ;;  %1394 = vmatprep.subr.mxu0 %v611_v18  ;;  %v1043_v15 = vunpack.c.h.bf16 %v548_v4  ;;  %v412_v18 = vld [vmem:[%s2403_s11 + $0x330] sm:$0xff]  ;;  %v1034_v23 = vunpack.c.l.bf16 %v544_v13 }
 0x118   : > { %1465 = vmatprep.subr.mxu1 %v867_v19  ;;  %1395 = vmatpush1.msra.mxu0 %v610_v20  ;;  %v540_v19 = vld [vmem:[%s2403_s11 + $0x730] sm:$0xff]  ;;  %v779_v20 = vunpack.c.h.bf16 %v416_v12  ;;  %v770_v28 = vunpack.c.l.bf16 %v412_v18 }
 0x119   : > { %1466 = vmatpush1.msra.mxu1 %v866_v21  ;;  %1396 = vmatprep.subr.mxu0 %v603_v24  ;;  %v1035_v21 = vunpack.c.h.bf16 %v544_v13  ;;  %v408_v24 = vld [vmem:[%s2403_s11 + $0x310] sm:$0xff]  ;;  %v1026_v29 = vunpack.c.l.bf16 %v540_v19 }
 0x11a   : > { %1467 = vmatprep.subr.mxu1 %v859_v25  ;;  %1397 = vmatpush1.msra.mxu0 %v602_v26  ;;  %v536_v25 = vld [vmem:[%s2403_s11 + $0x710] sm:$0xff]  ;;  %v771_v26 = vunpack.c.h.bf16 %v412_v18  ;;  %v762_v3 = vunpack.c.l.bf16 %v408_v24  ;;  %v501_v18 = vld [vmem:[%s2403_s11 + $0x5f8] sm:$0xff] }
 0x11b   : > { %1468 = vmatpush1.msra.mxu1 %v858_v27  ;;  %1398 = vmatprep.subr.mxu0 %v595_v30  ;;  %v1027_v27 = vunpack.c.h.bf16 %v540_v19  ;;  %v404_v30 = vld [vmem:[%s2403_s11 + $0x2f0] sm:$0xff]  ;;  %v1018_v34 = vunpack.c.l.bf16 %v536_v25 }
 0x11c   : > { %1469 = vmatprep.subr.mxu1 %v851_v31  ;;  %1399 = vmatpush1.msra.mxu0 %v594_v32  ;;  %v532_v31 = vld [vmem:[%s2403_s11 + $0x6f0] sm:$0xff]  ;;  %v763_v32 = vunpack.c.h.bf16 %v408_v24  ;;  %v754_v8 = vunpack.c.l.bf16 %v404_v30  ;;  %v2636_v24 = vld [vmem:[%s2396_s13 + $0x8] sm:$0xff] }
 0x11d   : > { %1470 = vmatpush1.msra.mxu1 %v850_v33  ;;  %1400 = vmatprep.subr.mxu0 %v587_v5  ;;  %v1019_v33 = vunpack.c.h.bf16 %v536_v25  ;;  %v400_v5 = vld [vmem:[%s2403_s11 + $0x2d0] sm:$0xff]  ;;  %v1010_v9 = vunpack.c.l.bf16 %v532_v31 }
 0x11e   : > { %1471 = vmatprep.subr.mxu1 %v843_v35  ;;  %1401 = vmatpush1.msra.mxu0 %v586_v36  ;;  %v528_v35 = vld [vmem:[%s2403_s11 + $0x6d0] sm:$0xff]  ;;  %v755_v36 = vunpack.c.h.bf16 %v404_v30  ;;  %v746_v42 = vunpack.c.l.bf16 %v400_v5 }
 0x11f   : > { %1472 = vmatpush1.msra.mxu1 %v842_v37  ;;  %1402 = vmatprep.subr.mxu0 %v579_v38  ;;  %v1011_v37 = vunpack.c.h.bf16 %v532_v31  ;;  %v396_v38 = vld [vmem:[%s2403_s11 + $0x2b0] sm:$0xff]  ;;  %v1002_v43 = vunpack.c.l.bf16 %v528_v35 }
 0x120   : > { %1473 = vmatprep.subr.mxu1 %v835_v39  ;;  %1403 = vmatpush1.msra.mxu0 %v578_v40  ;;  %v524_v39 = vld [vmem:[%s2403_s11 + $0x6b0] sm:$0xff]  ;;  %v747_v40 = vunpack.c.h.bf16 %v400_v5  ;;  %v738_v48 = vunpack.c.l.bf16 %v396_v38  ;;  %v361_v5 = vld [vmem:[%s2403_s11 + $0x198] sm:$0xff] }
 0x121   : > { %1474 = vmatpush1.msra.mxu1 %v834_v41  ;;  %1404 = vmatprep.subr.mxu0 %v571_v44  ;;  %v1003_v41 = vunpack.c.h.bf16 %v528_v35  ;;  %v392_v44 = vld [vmem:[%s2403_s11 + $0x290] sm:$0xff]  ;;  %v994_v49 = vunpack.c.l.bf16 %v524_v39  ;;  %v489_v35 = vld [vmem:[%s2403_s11 + $0x598] sm:$0xff] }
 0x122   : > { %1475 = vmatprep.subr.mxu1 %v827_v45  ;;  %1405 = vmatpush1.msra.mxu0 %v570_v46  ;;  %v520_v45 = vld [vmem:[%s2403_s11 + $0x690] sm:$0xff]  ;;  %v739_v46 = vunpack.c.h.bf16 %v396_v38  ;;  %v730_v54 = vunpack.c.l.bf16 %v392_v44  ;;  %v357_v38 = vld [vmem:[%s2403_s11 + $0x178] sm:$0xff] }
 0x123   : > { %1476 = vmatpush1.msra.mxu1 %v826_v47  ;;  %1406 = vmatprep.subr.mxu0 %v819_v50  ;;  %v995_v47 = vunpack.c.h.bf16 %v524_v39  ;;  %v388_v50 = vld [vmem:[%s2403_s11 + $0x270] sm:$0xff]  ;;  %v986_v55 = vunpack.c.l.bf16 %v520_v45  ;;  %v485_v39 = vld [vmem:[%s2403_s11 + $0x578] sm:$0xff] }
 0x124   : > { %1477 = vmatprep.subr.mxu1 %v1075_v51  ;;  %1407 = vmatpush2.msra.mxu0 %v818_v52  ;;  %v516_v51 = vld [vmem:[%s2403_s11 + $0x670] sm:$0xff]  ;;  %v731_v52 = vunpack.c.h.bf16 %v392_v44  ;;  %v722_v60 = vunpack.c.l.bf16 %v388_v50  ;;  %v353_v44 = vld [vmem:[%s2403_s11 + $0x158] sm:$0xff] }
 0x125   : > { %1478 = vmatpush2.msra.mxu1 %v1074_v53  ;;  %1408 = vmatprep.subr.mxu0 %v811_v56  ;;  %v987_v53 = vunpack.c.h.bf16 %v520_v45  ;;  %v384_v56 = vld [vmem:[%s2403_s11 + $0x250] sm:$0xff]  ;;  %v978_v61 = vunpack.c.l.bf16 %v516_v51  ;;  %v481_v45 = vld [vmem:[%s2403_s11 + $0x558] sm:$0xff] }
 0x126   : > { %1479 = vmatprep.subr.mxu1 %v1067_v57  ;;  %1409 = vmatpush2.msra.mxu0 %v810_v58  ;;  %v512_v57 = vld [vmem:[%s2403_s11 + $0x650] sm:$0xff]  ;;  %v723_v58 = vunpack.c.h.bf16 %v388_v50  ;;  %v714_v2 = vunpack.c.l.bf16 %v384_v56  ;;  %v349_v50 = vld [vmem:[%s2403_s11 + $0x138] sm:$0xff] }
 0x127   : > { %1480 = vmatpush2.msra.mxu1 %v1066_v59  ;;  %1410 = vmatprep.subr.mxu0 %v803_v62  ;;  %v979_v59 = vunpack.c.h.bf16 %v516_v51  ;;  %v380_v62 = vld [vmem:[%s2403_s11 + $0x230] sm:$0xff]  ;;  %v970_v4 = vunpack.c.l.bf16 %v512_v57  ;;  %v477_v51 = vld [vmem:[%s2403_s11 + $0x538] sm:$0xff] }
 0x128   : > { %1481 = vmatprep.subr.mxu1 %v1059_v63  ;;  %1411 = vmatpush2.msra.mxu0 %v802_v0  ;;  %v508_v63 = vld [vmem:[%s2403_s11 + $0x630] sm:$0xff]  ;;  %v715_v0 = vunpack.c.h.bf16 %v384_v56  ;;  %v706_v12 = vunpack.c.l.bf16 %v380_v62  ;;  %v345_v56 = vld [vmem:[%s2403_s11 + $0x118] sm:$0xff] }
 0x129   : > { %1482 = vmatpush2.msra.mxu1 %v1058_v1  ;;  %1412 = vmatprep.subr.mxu0 %v795_v6  ;;  %v971_v1 = vunpack.c.h.bf16 %v512_v57  ;;  %v376_v6 = vld [vmem:[%s2403_s11 + $0x210] sm:$0xff]  ;;  %v962_v13 = vunpack.c.l.bf16 %v508_v63  ;;  %v473_v57 = vld [vmem:[%s2403_s11 + $0x518] sm:$0xff] }
 0x12a   : > { %1483 = vmatprep.subr.mxu1 %v1051_v7  ;;  %1413 = vmatpush2.msra.mxu0 %v794_v10  ;;  %v504_v7 = vld [vmem:[%s2403_s11 + $0x610] sm:$0xff]  ;;  %v707_v10 = vunpack.c.h.bf16 %v380_v62  ;;  %v341_v62 = vld [vmem:[%s2403_s11 + $0xf8] sm:$0xff] }
 0x12b   : > { %1484 = vmatpush2.msra.mxu1 %v1050_v11  ;;  %1414 = vmatprep.subr.mxu0 %v787_v14  ;;  %v963_v11 = vunpack.c.h.bf16 %v508_v63  ;;  %v699_v14 = vunpack.c.h.bf16 %v376_v6  ;;  %v954_v19 = vunpack.c.l.bf16 %v504_v7  ;;  %v469_v63 = vld [vmem:[%s2403_s11 + $0x4f8] sm:$0xff] }
 0x12c   : > { %1485 = vmatprep.subr.mxu1 %v1043_v15  ;;  %1415 = vmatpush2.msra.mxu0 %v786_v16  ;;  %v955_v15 = vunpack.c.h.bf16 %v504_v7  ;;  %v698_v16 = vunpack.c.l.bf16 %v376_v6  ;;  %v337_v6 = vld [vmem:[%s2403_s11 + $0xd8] sm:$0xff] }
 0x12d   : > { %1486 = vmatpush2.msra.mxu1 %v1042_v17  ;;  %1416 = vmatprep.subr.mxu0 %v779_v20  ;;  %v373_v17 = vld [vmem:[%s2403_s11 + $0x1f8] sm:$0xff] }
 0x12e   : > { %1487 = vmatprep.subr.mxu1 %v1035_v21  ;;  %1417 = vmatpush2.msra.mxu0 %v778_v22  ;;  %v369_v20 = vld [vmem:[%s2403_s11 + $0x1d8] sm:$0xff]  ;;  %v693_v22 = vunpack.c.h.bf16 %v373_v17  ;;  %v692_v25 = vunpack.c.l.bf16 %v373_v17 }
 0x12f   : > { %1488 = vmatpush2.msra.mxu1 %v1034_v23  ;;  %1418 = vmatprep.subr.mxu0 %v771_v26  ;;  %v497_v21 = vld [vmem:[%s2403_s11 + $0x5d8] sm:$0xff]  ;;  %v949_v23 = vunpack.c.h.bf16 %v501_v18  ;;  %v948_v26 = vunpack.c.l.bf16 %v501_v18  ;;  %v685_v30 = vunpack.c.h.bf16 %v369_v20  ;;  %v620_v18 = vunpack.c.l.bf16 %v337_v6 }
 0x130   : > { %1489 = vmatprep.subr.mxu1 %v1027_v27  ;;  %1419 = vmatpush2.msra.mxu0 %v770_v28  ;;  %v365_v27 = vld [vmem:[%s2403_s11 + $0x1b8] sm:$0xff]  ;;  %v941_v31 = vunpack.c.h.bf16 %v497_v21 }
 0x131   : > { %1490 = vmatpush2.msra.mxu1 %v1026_v29  ;;  %1420 = vmatprep.subr.mxu0 %v763_v32  ;;  %v493_v28 = vld [vmem:[%s2403_s11 + $0x5b8] sm:$0xff]  ;;  %v2646_v32 = vld [vmem:[%s2396_s13] sm:$0xff] }
 0x132   : > { %1491 = vmatprep.subr.mxu1 %v1019_v33  ;;  %1421 = vmatpush2.msra.mxu0 %v762_v3  ;;  %v2642_v29 = vld [vmem:[%s2396_s13 + $0x18] sm:$0xff]  ;;  %v2650_v33 = vld [vmem:[%s2396_s13 + $0x10] sm:$0xff]  ;;  %v684_v3 = vunpack.c.l.bf16 %v369_v20 }
 0x133   : > { %1492 = vmatpush2.msra.mxu1 %v1018_v34  ;;  %1422 = vmatprep.subr.mxu0 %v755_v36  ;;  %v940_v34 = vunpack.c.l.bf16 %v497_v21  ;;  %v677_v36 = vunpack.c.h.bf16 %v365_v27  ;;  %v465_v7 = vld [vmem:[%s2403_s11 + $0x4d8] sm:$0xff] }
 0x134   : > { %1493 = vmatprep.subr.mxu1 %v1011_v37  ;;  %1423 = vmatpush2.msra.mxu0 %v754_v8  ;;  %v933_v37 = vunpack.c.h.bf16 %v493_v28  ;;  %v676_v8 = vunpack.c.l.bf16 %v365_v27  ;;  %v877_v17 = vunpack.c.h.bf16 %v465_v7  ;;  %v329_v20 = vld [vmem:[%s2403_s11 + $0x98] sm:$0xff] }
 0x135   : > { %1494 = vmatpush2.msra.mxu1 %v1010_v9  ;;  %1424 = vmatprep.subr.mxu0 %v747_v40  ;;  %v932_v9 = vunpack.c.l.bf16 %v493_v28  ;;  %v669_v40 = vunpack.c.h.bf16 %v361_v5  ;;  %v457_v21 = vld [vmem:[%s2403_s11 + $0x498] sm:$0xff] }
 0x136   : > { %1495 = vmatprep.subr.mxu1 %v1003_v41  ;;  %1425 = vmatpush2.msra.mxu0 %v746_v42  ;;  %v925_v41 = vunpack.c.h.bf16 %v489_v35  ;;  %v668_v42 = vunpack.c.l.bf16 %v361_v5  ;;  %v325_v27 = vld [vmem:[%s2403_s11 + $0x78] sm:$0xff] }
 0x137   : > { %1496 = vmatpush2.msra.mxu1 %v1002_v43  ;;  %1426 = vmatprep.subr.mxu0 %v739_v46  ;;  %v924_v43 = vunpack.c.l.bf16 %v489_v35  ;;  %v661_v46 = vunpack.c.h.bf16 %v357_v38  ;;  %v453_v28 = vld [vmem:[%s2403_s11 + $0x478] sm:$0xff] }
 0x138   : > { %1497 = vmatprep.subr.mxu1 %v995_v47  ;;  %1427 = vmatpush2.msra.mxu0 %v738_v48  ;;  %v917_v47 = vunpack.c.h.bf16 %v485_v39  ;;  %v660_v48 = vunpack.c.l.bf16 %v357_v38  ;;  %v321_v5 = vld [vmem:[%s2403_s11 + $0x58] sm:$0xff] }
 0x139   : > { %1498 = vmatpush2.msra.mxu1 %v994_v49  ;;  %1428 = vmatprep.subr.mxu0 %v731_v52  ;;  %v916_v49 = vunpack.c.l.bf16 %v485_v39  ;;  %v653_v52 = vunpack.c.h.bf16 %v353_v44  ;;  %v449_v35 = vld [vmem:[%s2403_s11 + $0x458] sm:$0xff] }
 0x13a   : > { %1499 = vmatprep.subr.mxu1 %v987_v53  ;;  %1429 = vmatpush2.msra.mxu0 %v730_v54  ;;  %v909_v53 = vunpack.c.h.bf16 %v481_v45  ;;  %v652_v54 = vunpack.c.l.bf16 %v353_v44  ;;  %v317_v38 = vld [vmem:[%s2403_s11 + $0x38] sm:$0xff] }
 0x13b   : > { %1500 = vmatpush2.msra.mxu1 %v986_v55  ;;  %1430 = vmatprep.subr.mxu0 %v723_v58  ;;  %v908_v55 = vunpack.c.l.bf16 %v481_v45  ;;  %v645_v58 = vunpack.c.h.bf16 %v349_v50  ;;  %v445_v39 = vld [vmem:[%s2403_s11 + $0x438] sm:$0xff] }
 0x13c   : > { %1501 = vmatprep.subr.mxu1 %v979_v59  ;;  %1431 = vmatpush2.msra.mxu0 %v722_v60  ;;  %v901_v59 = vunpack.c.h.bf16 %v477_v51  ;;  %v644_v60 = vunpack.c.l.bf16 %v349_v50  ;;  %v313_v44 = vld [vmem:[%s2403_s11 + $0x18] sm:$0xff] }
 0x13d   : > { %1502 = vmatpush2.msra.mxu1 %v978_v61  ;;  %1432 = vmatprep.subr.mxu0 %v715_v0  ;;  %v900_v61 = vunpack.c.l.bf16 %v477_v51  ;;  %v637_v0 = vunpack.c.h.bf16 %v345_v56  ;;  %v441_v45 = vld [vmem:[%s2403_s11 + $0x418] sm:$0xff] }
 0x13e   : > { %1503 = vmatprep.subr.mxu1 %v971_v1  ;;  %1433 = vmatpush2.msra.mxu0 %v714_v2  ;;  %v893_v1 = vunpack.c.h.bf16 %v473_v57  ;;  %v636_v2 = vunpack.c.l.bf16 %v345_v56  ;;  %v437_v50 = vld [vmem:[%s2403_s11 + $0x3f8] sm:$0xff] }
 0x13f   : > { %1504 = vmatpush2.msra.mxu1 %v970_v4  ;;  %1434 = vmatprep.subr.mxu0 %v707_v10  ;;  %v892_v4 = vunpack.c.l.bf16 %v473_v57  ;;  %v629_v10 = vunpack.c.h.bf16 %v341_v62  ;;  %v565_v51 = vld [vmem:[%s2403_s11 + $0x7f8] sm:$0xff] }
 0x140   : > { %1505 = vmatprep.subr.mxu1 %v963_v11  ;;  %1435 = vmatpush2.msra.mxu0 %v706_v12  ;;  %v885_v11 = vunpack.c.h.bf16 %v469_v63  ;;  %v628_v12 = vunpack.c.l.bf16 %v341_v62  ;;  %v433_v56 = vld [vmem:[%s2403_s11 + $0x3d8] sm:$0xff] }
 0x141   : > { %1506 = vmatpush2.msra.mxu1 %v962_v13  ;;  %1436 = vmatprep.subr.mxu0 %v699_v14  ;;  %v884_v13 = vunpack.c.l.bf16 %v469_v63  ;;  %v333_v14 = vld [vmem:[%s2403_s11 + $0xb8] sm:$0xff] }
 0x142   : > { %1507 = vmatprep.subr.mxu1 %v955_v15  ;;  %1437 = vmatpush2.msra.mxu0 %v698_v16  ;;  %v461_v15 = vld [vmem:[%s2403_s11 + $0x4b8] sm:$0xff]  ;;  %v621_v16 = vunpack.c.h.bf16 %v337_v6 }
 0x143   : > { %1438 = vmatprep.mubr.f32.mxu0 %v2636_v24  ;;  %1508 = vmatpush2.msra.mxu1 %v954_v19  ;;  %v876_v19 = vunpack.c.l.bf16 %v465_v7  ;;  %v561_v57 = vld [vmem:[%s2403_s11 + $0x7d8] sm:$0xff] }
 0x144   : > { %1509 = vmatprep.mubr.f32.mxu1 %v2642_v29  ;;  %1439 = vmatmul.mubr.f32.vlgmr.msra.gmra.mxu0 %v2646_v32  ;;  %v429_v62 = vld [vmem:[%s2403_s11 + $0x3b8] sm:$0xff] }
 0x145   : > { %1510 = vmatmul.mubr.f32.vlgmr.msra.gmra.mxu1 %v2650_v33  ;;  %1516 = vmatprep.subr.mxu0 %v693_v22  ;;  %v613_v22 = vunpack.c.h.bf16 %v333_v14  ;;  %v557_v63 = vld [vmem:[%s2403_s11 + $0x7b8] sm:$0xff] }
 0x146   : > { %1587 = vmatprep.subr.mxu1 %v949_v23  ;;  %1517 = vmatpush1.msra.mxu0 %v692_v25  ;;  %v869_v23 = vunpack.c.h.bf16 %v461_v15  ;;  %v612_v25 = vunpack.c.l.bf16 %v333_v14  ;;  %v425_v6 = vld [vmem:[%s2403_s11 + $0x398] sm:$0xff] }
 0x147   : > { %1588 = vmatpush1.msra.mxu1 %v948_v26  ;;  %1518 = vmatprep.subr.mxu0 %v685_v30  ;;  %v868_v26 = vunpack.c.l.bf16 %v461_v15  ;;  %v605_v30 = vunpack.c.h.bf16 %v329_v20  ;;  %v553_v7 = vld [vmem:[%s2403_s11 + $0x798] sm:$0xff] }
 0x148   : > { %1589 = vmatprep.subr.mxu1 %v941_v31  ;;  %1519 = vmatpush1.msra.mxu0 %v684_v3  ;;  %v861_v31 = vunpack.c.h.bf16 %v457_v21  ;;  %v604_v3 = vunpack.c.l.bf16 %v329_v20  ;;  %v421_v14 = vld [vmem:[%s2403_s11 + $0x378] sm:$0xff] }
 0x149   : > { %1590 = vmatpush1.msra.mxu1 %v940_v34  ;;  %1520 = vmatprep.subr.mxu0 %v677_v36  ;;  %v860_v34 = vunpack.c.l.bf16 %v457_v21  ;;  %v597_v36 = vunpack.c.h.bf16 %v325_v27  ;;  %v549_v15 = vld [vmem:[%s2403_s11 + $0x778] sm:$0xff] }
 0x14a   : > { %1591 = vmatprep.subr.mxu1 %v933_v37  ;;  %1521 = vmatpush1.msra.mxu0 %v676_v8  ;;  %v853_v37 = vunpack.c.h.bf16 %v453_v28  ;;  %v596_v8 = vunpack.c.l.bf16 %v325_v27  ;;  %v417_v20 = vld [vmem:[%s2403_s11 + $0x358] sm:$0xff] }
 0x14b   : > { %1592 = vmatpush1.msra.mxu1 %v932_v9  ;;  %1522 = vmatprep.subr.mxu0 %v669_v40  ;;  %v852_v9 = vunpack.c.l.bf16 %v453_v28  ;;  %v589_v40 = vunpack.c.h.bf16 %v321_v5  ;;  %v545_v21 = vld [vmem:[%s2403_s11 + $0x758] sm:$0xff] }
 0x14c   : > { %1593 = vmatprep.subr.mxu1 %v925_v41  ;;  %1523 = vmatpush1.msra.mxu0 %v668_v42  ;;  %v845_v41 = vunpack.c.h.bf16 %v449_v35  ;;  %v588_v42 = vunpack.c.l.bf16 %v321_v5  ;;  %v413_v27 = vld [vmem:[%s2403_s11 + $0x338] sm:$0xff] }
 0x14d   : > { %1594 = vmatpush1.msra.mxu1 %v924_v43  ;;  %1524 = vmatprep.subr.mxu0 %v661_v46  ;;  %v844_v43 = vunpack.c.l.bf16 %v449_v35  ;;  %v581_v46 = vunpack.c.h.bf16 %v317_v38  ;;  %v541_v28 = vld [vmem:[%s2403_s11 + $0x738] sm:$0xff] }
 0x14e   : > { %1595 = vmatprep.subr.mxu1 %v917_v47  ;;  %1525 = vmatpush1.msra.mxu0 %v660_v48  ;;  %v837_v47 = vunpack.c.h.bf16 %v445_v39  ;;  %v580_v48 = vunpack.c.l.bf16 %v317_v38  ;;  %v409_v5 = vld [vmem:[%s2403_s11 + $0x318] sm:$0xff] }
 0x14f   : > { %1596 = vmatpush1.msra.mxu1 %v916_v49  ;;  %1526 = vmatprep.subr.mxu0 %v653_v52  ;;  %v836_v49 = vunpack.c.l.bf16 %v445_v39  ;;  %v573_v52 = vunpack.c.h.bf16 %v313_v44  ;;  %v537_v35 = vld [vmem:[%s2403_s11 + $0x718] sm:$0xff] }
 0x150   : > { %1597 = vmatprep.subr.mxu1 %v909_v53  ;;  %1527 = vmatpush1.msra.mxu0 %v652_v54  ;;  %v829_v53 = vunpack.c.h.bf16 %v441_v45  ;;  %v572_v54 = vunpack.c.l.bf16 %v313_v44  ;;  %v405_v38 = vld [vmem:[%s2403_s11 + $0x2f8] sm:$0xff] }
 0x151   : > { %1598 = vmatpush1.msra.mxu1 %v908_v55  ;;  %1528 = vmatprep.subr.mxu0 %v645_v58  ;;  %v828_v55 = vunpack.c.l.bf16 %v441_v45  ;;  %v821_v58 = vunpack.c.h.bf16 %v437_v50  ;;  %v533_v39 = vld [vmem:[%s2403_s11 + $0x6f8] sm:$0xff] }
 0x152   : > { %1599 = vmatprep.subr.mxu1 %v901_v59  ;;  %1529 = vmatpush1.msra.mxu0 %v644_v60  ;;  %v1077_v59 = vunpack.c.h.bf16 %v565_v51  ;;  %v820_v60 = vunpack.c.l.bf16 %v437_v50  ;;  %v401_v44 = vld [vmem:[%s2403_s11 + $0x2d8] sm:$0xff] }
 0x153   : > { %1600 = vmatpush1.msra.mxu1 %v900_v61  ;;  %1530 = vmatprep.subr.mxu0 %v637_v0  ;;  %v1076_v61 = vunpack.c.l.bf16 %v565_v51  ;;  %v813_v0 = vunpack.c.h.bf16 %v433_v56  ;;  %v529_v45 = vld [vmem:[%s2403_s11 + $0x6d8] sm:$0xff] }
 0x154   : > { %1601 = vmatprep.subr.mxu1 %v893_v1  ;;  %1531 = vmatpush1.msra.mxu0 %v636_v2  ;;  %v1069_v1 = vunpack.c.h.bf16 %v561_v57  ;;  %v812_v2 = vunpack.c.l.bf16 %v433_v56  ;;  %v397_v50 = vld [vmem:[%s2403_s11 + $0x2b8] sm:$0xff] }
 0x155   : > { %1602 = vmatpush1.msra.mxu1 %v892_v4  ;;  %1532 = vmatprep.subr.mxu0 %v629_v10  ;;  %v1068_v4 = vunpack.c.l.bf16 %v561_v57  ;;  %v805_v10 = vunpack.c.h.bf16 %v429_v62  ;;  %v525_v51 = vld [vmem:[%s2403_s11 + $0x6b8] sm:$0xff] }
 0x156   : > { %1603 = vmatprep.subr.mxu1 %v885_v11  ;;  %1533 = vmatpush1.msra.mxu0 %v628_v12  ;;  %v1061_v11 = vunpack.c.h.bf16 %v557_v63  ;;  %v804_v12 = vunpack.c.l.bf16 %v429_v62  ;;  %v393_v56 = vld [vmem:[%s2403_s11 + $0x298] sm:$0xff] }
 0x157   : > { %1604 = vmatpush1.msra.mxu1 %v884_v13  ;;  %1534 = vmatprep.subr.mxu0 %v621_v16  ;;  %v1060_v13 = vunpack.c.l.bf16 %v557_v63  ;;  %v797_v16 = vunpack.c.h.bf16 %v425_v6  ;;  %v521_v57 = vld [vmem:[%s2403_s11 + $0x698] sm:$0xff] }
 0x158   : > { %1605 = vmatprep.subr.mxu1 %v877_v17  ;;  %1535 = vmatpush1.msra.mxu0 %v620_v18  ;;  %v1053_v17 = vunpack.c.h.bf16 %v553_v7  ;;  %v796_v18 = vunpack.c.l.bf16 %v425_v6  ;;  %v389_v62 = vld [vmem:[%s2403_s11 + $0x278] sm:$0xff] }
 0x159   : > { %1606 = vmatpush1.msra.mxu1 %v876_v19  ;;  %1536 = vmatprep.subr.mxu0 %v613_v22  ;;  %v1052_v19 = vunpack.c.l.bf16 %v553_v7  ;;  %v789_v22 = vunpack.c.h.bf16 %v421_v14  ;;  %v517_v63 = vld [vmem:[%s2403_s11 + $0x678] sm:$0xff] }
 0x15a   : > { %1607 = vmatprep.subr.mxu1 %v869_v23  ;;  %1537 = vmatpush1.msra.mxu0 %v612_v25  ;;  %v1045_v23 = vunpack.c.h.bf16 %v549_v15  ;;  %v788_v25 = vunpack.c.l.bf16 %v421_v14  ;;  %v385_v6 = vld [vmem:[%s2403_s11 + $0x258] sm:$0xff] }
 0x15b   : > { %1608 = vmatpush1.msra.mxu1 %v868_v26  ;;  %1538 = vmatprep.subr.mxu0 %v605_v30  ;;  %v1044_v26 = vunpack.c.l.bf16 %v549_v15  ;;  %v781_v30 = vunpack.c.h.bf16 %v417_v20  ;;  %v513_v7 = vld [vmem:[%s2403_s11 + $0x658] sm:$0xff] }
 0x15c   : > { %1609 = vmatprep.subr.mxu1 %v861_v31  ;;  %1539 = vmatpush1.msra.mxu0 %v604_v3  ;;  %v1037_v31 = vunpack.c.h.bf16 %v545_v21  ;;  %v780_v3 = vunpack.c.l.bf16 %v417_v20  ;;  %v381_v14 = vld [vmem:[%s2403_s11 + $0x238] sm:$0xff] }
 0x15d   : > { %1610 = vmatpush1.msra.mxu1 %v860_v34  ;;  %1540 = vmatprep.subr.mxu0 %v597_v36  ;;  %v1036_v34 = vunpack.c.l.bf16 %v545_v21  ;;  %v773_v36 = vunpack.c.h.bf16 %v413_v27  ;;  %v509_v15 = vld [vmem:[%s2403_s11 + $0x638] sm:$0xff] }
 0x15e   : > { %1611 = vmatprep.subr.mxu1 %v853_v37  ;;  %1541 = vmatpush1.msra.mxu0 %v596_v8  ;;  %v1029_v37 = vunpack.c.h.bf16 %v541_v28  ;;  %v772_v8 = vunpack.c.l.bf16 %v413_v27  ;;  %v377_v20 = vld [vmem:[%s2403_s11 + $0x218] sm:$0xff] }
 0x15f   : > { %1612 = vmatpush1.msra.mxu1 %v852_v9  ;;  %1542 = vmatprep.subr.mxu0 %v589_v40  ;;  %v1028_v9 = vunpack.c.l.bf16 %v541_v28  ;;  %v765_v40 = vunpack.c.h.bf16 %v409_v5  ;;  %v505_v21 = vld [vmem:[%s2403_s11 + $0x618] sm:$0xff]  ;;  %v701_v27 = vunpack.c.h.bf16 %v377_v20 }
 0x160   : > { %1613 = vmatprep.subr.mxu1 %v845_v41  ;;  %1543 = vmatpush1.msra.mxu0 %v588_v42  ;;  %v1021_v41 = vunpack.c.h.bf16 %v537_v35  ;;  %v764_v42 = vunpack.c.l.bf16 %v409_v5  ;;  %v957_v28 = vunpack.c.h.bf16 %v505_v21  ;;  %v956_v5 = vunpack.c.l.bf16 %v505_v21 }
 0x161   : > { %1614 = vmatpush1.msra.mxu1 %v844_v43  ;;  %1544 = vmatprep.subr.mxu0 %v581_v46  ;;  %v1020_v43 = vunpack.c.l.bf16 %v537_v35  ;;  %v757_v46 = vunpack.c.h.bf16 %v405_v38 }
 0x162   : > { %1615 = vmatprep.subr.mxu1 %v837_v47  ;;  %1545 = vmatpush1.msra.mxu0 %v580_v48  ;;  %v1013_v47 = vunpack.c.h.bf16 %v533_v39  ;;  %v756_v48 = vunpack.c.l.bf16 %v405_v38 }
 0x163   : > { %1616 = vmatpush1.msra.mxu1 %v836_v49  ;;  %1546 = vmatprep.subr.mxu0 %v573_v52  ;;  %v1012_v49 = vunpack.c.l.bf16 %v533_v39  ;;  %v749_v52 = vunpack.c.h.bf16 %v401_v44 }
 0x164   : > { %1617 = vmatprep.subr.mxu1 %v829_v53  ;;  %1547 = vmatpush1.msra.mxu0 %v572_v54  ;;  %v1005_v53 = vunpack.c.h.bf16 %v529_v45  ;;  %v748_v54 = vunpack.c.l.bf16 %v401_v44 }
 0x165   : > { %1618 = vmatpush1.msra.mxu1 %v828_v55  ;;  %1548 = vmatprep.subr.mxu0 %v821_v58  ;;  %v1004_v55 = vunpack.c.l.bf16 %v529_v45  ;;  %v741_v58 = vunpack.c.h.bf16 %v397_v50  ;;  %v1081_v45 = vld [vmem:[#allocation2 + $0x10] sm:$0xff] }
 0x166   : > { %1619 = vmatprep.subr.mxu1 %v1077_v59  ;;  %1549 = vmatpush2.msra.mxu0 %v820_v60  ;;  %v997_v59 = vunpack.c.h.bf16 %v525_v51  ;;  %v740_v60 = vunpack.c.l.bf16 %v397_v50 }
 0x167   : > { %1620 = vmatpush2.msra.mxu1 %v1076_v61  ;;  %1550 = vmatprep.subr.mxu0 %v813_v0  ;;  %v996_v61 = vunpack.c.l.bf16 %v525_v51  ;;  %v733_v0 = vunpack.c.h.bf16 %v393_v56 }
 0x168   : > { %1621 = vmatprep.subr.mxu1 %v1069_v1  ;;  %1551 = vmatpush2.msra.mxu0 %v812_v2  ;;  %v989_v1 = vunpack.c.h.bf16 %v521_v57  ;;  %v732_v2 = vunpack.c.l.bf16 %v393_v56 }
 0x169   : > { %1622 = vmatpush2.msra.mxu1 %v1068_v4  ;;  %1552 = vmatprep.subr.mxu0 %v805_v10  ;;  %v988_v4 = vunpack.c.l.bf16 %v521_v57  ;;  %v725_v10 = vunpack.c.h.bf16 %v389_v62  ;;  %v1084_v57 = vld [vmem:[#allocation2 + $0x28] sm:$0xff] }
 0x16a   : > { %1623 = vmatprep.subr.mxu1 %v1061_v11  ;;  %1553 = vmatpush2.msra.mxu0 %v804_v12  ;;  %v981_v11 = vunpack.c.h.bf16 %v517_v63  ;;  %v724_v12 = vunpack.c.l.bf16 %v389_v62 }
 0x16b   : > { %1624 = vmatpush2.msra.mxu1 %v1060_v13  ;;  %1554 = vmatprep.subr.mxu0 %v797_v16  ;;  %v980_v13 = vunpack.c.l.bf16 %v517_v63  ;;  %v717_v16 = vunpack.c.h.bf16 %v385_v6 }
 0x16c   : > { %1625 = vmatprep.subr.mxu1 %v1053_v17  ;;  %1555 = vmatpush2.msra.mxu0 %v796_v18  ;;  %v973_v17 = vunpack.c.h.bf16 %v513_v7  ;;  %v716_v18 = vunpack.c.l.bf16 %v385_v6 }
 0x16d   : > { %1626 = vmatpush2.msra.mxu1 %v1052_v19  ;;  %1556 = vmatprep.subr.mxu0 %v789_v22  ;;  %v972_v19 = vunpack.c.l.bf16 %v513_v7  ;;  %v709_v22 = vunpack.c.h.bf16 %v381_v14 }
 0x16e   : > { %1627 = vmatprep.subr.mxu1 %v1045_v23  ;;  %1557 = vmatpush2.msra.mxu0 %v788_v25  ;;  %v965_v23 = vunpack.c.h.bf16 %v509_v15  ;;  %v708_v25 = vunpack.c.l.bf16 %v381_v14 }
 0x16f   : > { %1628 = vmatpush2.msra.mxu1 %v1044_v26  ;;  %1558 = vmatprep.subr.mxu0 %v781_v30  ;;  %v964_v26 = vunpack.c.l.bf16 %v509_v15  ;;  %v700_v30 = vunpack.c.l.bf16 %v377_v20 }
 0x170   : > { %1629 = vmatprep.subr.mxu1 %v1037_v31  ;;  %1559 = vmatpush2.msra.mxu0 %v780_v3  ;;  %v1078_v3 = vld [vmem:[#allocation2 + $0x30] sm:$0xff] }
 0x171   : > { %1630 = vmatpush2.msra.mxu1 %v1036_v34  ;;  %1560 = vmatprep.subr.mxu0 %v773_v36 }
 0x172   : > { %1631 = vmatprep.subr.mxu1 %v1029_v37  ;;  %1561 = vmatpush2.msra.mxu0 %v772_v8  ;;  %v1079_v37 = vld [vmem:[#allocation2] sm:$0xff] }
 0x173   : > { %1632 = vmatpush2.msra.mxu1 %v1028_v9  ;;  %1562 = vmatprep.subr.mxu0 %v765_v40 }
 0x174   : > { %1633 = vmatprep.subr.mxu1 %v1021_v41  ;;  %1563 = vmatpush2.msra.mxu0 %v764_v42  ;;  %v1080_v41 = vld [vmem:[#allocation2 + $0x18] sm:$0xff] }
 0x175   : > { %1634 = vmatpush2.msra.mxu1 %v1020_v43  ;;  %1564 = vmatprep.subr.mxu0 %v757_v46 }
 0x176   : > { %1635 = vmatprep.subr.mxu1 %v1013_v47  ;;  %1565 = vmatpush2.msra.mxu0 %v756_v48 }
 0x177   : > { %1636 = vmatpush2.msra.mxu1 %v1012_v49  ;;  %1566 = vmatprep.subr.mxu0 %v749_v52  ;;  %v1082_v49 = vld [vmem:[#allocation2 + $0x8] sm:$0xff]  ;;  %v1083_v52 = vld [vmem:[#allocation2 + $0x20] sm:$0xff] }
 0x178   : > { %1637 = vmatprep.subr.mxu1 %v1005_v53  ;;  %1567 = vmatpush2.msra.mxu0 %v748_v54 }
 0x179   : > { %1638 = vmatpush2.msra.mxu1 %v1004_v55  ;;  %1568 = vmatprep.subr.mxu0 %v741_v58 }
 0x17a   : > { %1639 = vmatprep.subr.mxu1 %v997_v59  ;;  %1569 = vmatpush2.msra.mxu0 %v740_v60 }
 0x17b   : > { %1640 = vmatpush2.msra.mxu1 %v996_v61  ;;  %1570 = vmatprep.subr.mxu0 %v733_v0  ;;  %v1085_v61 = vld [vmem:[#allocation2 + $0x38] sm:$0xff] }
 0x17c   : > { %1641 = vmatprep.subr.mxu1 %v989_v1  ;;  %1571 = vmatpush2.msra.mxu0 %v732_v2 }
 0x17d   : > { %1642 = vmatpush2.msra.mxu1 %v988_v4  ;;  %1572 = vmatprep.subr.mxu0 %v725_v10 }
 0x17e   : > { %1643 = vmatprep.subr.mxu1 %v981_v11  ;;  %1573 = vmatpush2.msra.mxu0 %v724_v12 }
 0x17f   : > { %1644 = vmatpush2.msra.mxu1 %v980_v13  ;;  %1574 = vmatprep.subr.mxu0 %v717_v16 }
 0x180   : > { %1645 = vmatprep.subr.mxu1 %v973_v17  ;;  %1575 = vmatpush2.msra.mxu0 %v716_v18  ;;  %v1156_v31 = vpop.f32.mrf.mxu0 }
 0x181   : > { %1646 = vmatpush2.msra.mxu1 %v972_v19  ;;  %v1227_v34 = vpop.f32.mrf.mxu1  ;;  %1576 = vmatprep.subr.mxu0 %v709_v22 }
 0x182   : > { %1647 = vmatprep.subr.mxu1 %v965_v23  ;;  %v1228_v35 = vadd.f32 %v1227_v34, %v1156_v31  ;;  %1577 = vmatpush2.msra.mxu0 %v708_v25  ;;  %v1158_v36 = vpop.f32.mrf.mxu0 }
 0x183   : > { %1648 = vmatpush2.msra.mxu1 %v964_v26  ;;  %v1229_v8 = vpop.f32.mrf.mxu1  ;;  %1578 = vmatprep.subr.mxu0 %v701_v27 }
 0x184   : > { %1649 = vmatprep.subr.mxu1 %v957_v28  ;;  %v1658_v9 = vadd.f32 %v1228_v35, %v1078_v3  ;;  %v1230_v38 = vadd.f32 %v1229_v8, %v1158_v36  ;;  %1579 = vmatpush2.msra.mxu0 %v700_v30 }
 0x185   : > { %1580 = vmatprep.mubr.f32.mxu0 %v2636_v24  ;;  %1650 = vmatpush2.msra.mxu1 %v956_v5 }
 0x186   : > { %1651 = vmatprep.mubr.f32.mxu1 %v2642_v29  ;;  %1666 = vst [vmem:[#allocation2 + $0x30] sm:$0xff] %v1658_v9  ;;  %v1659_v39 = vadd.f32 %v1230_v38, %v1079_v37  ;;  %1581 = vmatmul.mubr.f32.vlgmr.msra.gmra.mxu0 %v2646_v32 }
 0x187   : > { %1652 = vmatmul.mubr.f32.vlgmr.msra.gmra.mxu1 %v2650_v33 }
 0x188   : > { %1667 = vst [vmem:[#allocation2] sm:$0xff] %v1659_v39 }
 0x1c2   : > { %v1298_v40 = vpop.f32.mrf.mxu0 }
 0x1c3   : > { %v1369_v42 = vpop.f32.mrf.mxu1 }
 0x1c4   : > { %v1370_v43 = vadd.f32 %v1369_v42, %v1298_v40  ;;  %v1300_v44 = vpop.f32.mrf.mxu0 }
 0x1c5   : > { %v1371_v46 = vpop.f32.mrf.mxu1 }
 0x1c6   : > { %v1660_v47 = vadd.f32 %v1370_v43, %v1080_v41  ;;  %v1372_v48 = vadd.f32 %v1371_v46, %v1300_v44 }
 0x1c8   : > { %1668 = vst [vmem:[#allocation2 + $0x18] sm:$0xff] %v1660_v47  ;;  %v1661_v24 = vadd.f32 %v1372_v48, %v1081_v45 }
 0x1ca   : > { %1669 = vst [vmem:[#allocation2 + $0x10] sm:$0xff] %v1661_v24 }
 0x204   : > { %v1440_v29 = vpop.f32.mrf.mxu0 }
 0x205   : > { %v1511_v50 = vpop.f32.mrf.mxu1 }
 0x206   : > { %v1512_v51 = vadd.f32 %v1511_v50, %v1440_v29  ;;  %v1442_v32 = vpop.f32.mrf.mxu0 }
 0x207   : > { %v1513_v33 = vpop.f32.mrf.mxu1 }
 0x208   : > { %v1662_v53 = vadd.f32 %v1512_v51, %v1082_v49  ;;  %v1514_v54 = vadd.f32 %v1513_v33, %v1442_v32 }
 0x20a   : > { %1670 = vst [vmem:[#allocation2 + $0x8] sm:$0xff] %v1662_v53  ;;  %v1663_v55 = vadd.f32 %v1514_v54, %v1083_v52 }
 0x20c   : > { %1671 = vst [vmem:[#allocation2 + $0x20] sm:$0xff] %v1663_v55 }
 0x246   : > { %v1582_v56 = vpop.f32.mrf.mxu0 }
 0x247   : > { %v1653_v58 = vpop.f32.mrf.mxu1 }
 0x248   : > { %v1654_v59 = vadd.f32 %v1653_v58, %v1582_v56  ;;  %v1584_v60 = vpop.f32.mrf.mxu0 }
 0x249   : > { %v1655_v62 = vpop.f32.mrf.mxu1 }
 0x24a   : > { %v1664_v63 = vadd.f32 %v1654_v59, %v1084_v57  ;;  %v1656_v0 = vadd.f32 %v1655_v62, %v1584_v60  ;;  %1677 = sbr.rel (%p1969_p12) target bundleno = 799 (0x31f), region = 64 }
 0x24c   : > { %1672 = vst [vmem:[#allocation2 + $0x28] sm:$0xff] %v1664_v63  ;;  %v1665_v1 = vadd.f32 %v1656_v0, %v1085_v61 }
 0x24e   : > { %1673 = vst [vmem:[#allocation2 + $0x38] sm:$0xff] %v1665_v1 }
 0x24f   : > { %v1688_v2 = vlaneseq  ;;  %v1686_v6 = vld [vmem:[#allocation8] sm:$0xff]  ;;  %v1678_v13 = vld [vmem:[#allocation2 + $0x30] sm:$0xff]  ;;  %v1680_v21 = vld [vmem:[#allocation2 + $0x18] sm:$0xff]  ;;  %vm1868_vm8 = vcmask 7168  }
 0x250   : > { %v1679_v16 = vld [vmem:[#allocation2] sm:$0xff]  ;;  %v1681_v27 = vld [vmem:[#allocation2 + $0x10] sm:$0xff]  ;;  %v1682_v28 = vld [vmem:[#allocation2 + $0x8] sm:$0xff] }
 0x251   : > { %v1689_v4 = vshrl.u32 %v1688_v2, 7  ;;  %v1683_v30 = vld [vmem:[#allocation2 + $0x20] sm:$0xff]  ;;  %v1760_v5 = vld [vmem:[#allocation9] sm:$0xff] }
 0x252   : > { %v1761_v41 = vunpack.c.l.bf16 %v1760_v5  ;;  %v1762_v44 = vunpack.c.h.bf16 %v1760_v5 }
 0x253   : > { %v2716_v7 = vsub.s32 0, %v1689_v4  ;;  %v1694_v10 = vsub.s32 1, %v1689_v4  ;;  %v2718_v11 = vsub.s32 2, %v1689_v4  ;;  %v1702_v12 = vsub.s32 3, %v1689_v4  ;;  %v1684_v35 = vld [vmem:[#allocation2 + $0x28] sm:$0xff] }
 0x254   : > { %v2720_v14 = vsub.s32 4, %v1689_v4  ;;  %v1710_v15 = vsub.s32 5, %v1689_v4  ;;  %v1718_v20 = vsub.s32 7, %v1689_v4  ;;  %v2725_v26 = vsub.s32 6, %v1689_v4 }
 0x255   : > { %v1691_v17 = vrot.slane %v1686_v6, %v2716_v7  ;;  %v1695_v18 = vrot.slane %v1686_v6, %v1694_v10  ;;  %v1699_v19 = vrot.slane %v1686_v6, %v2718_v11  ;;  %v1703_v22 = vrot.slane %v1686_v6, %v1702_v12  ;;  %v1685_v8 = vld [vmem:[#allocation2 + $0x38] sm:$0xff] }
 0x256   : > { %v1707_v23 = vrot.slane %v1686_v6, %v2720_v14  ;;  %v1711_v25 = vrot.slane %v1686_v6, %v1710_v15  ;;  %v1715_v3 = vrot.slane %v1686_v6, %v2725_v26  ;;  %v1719_v36 = vrot.slane %v1686_v6, %v1718_v20 }
 0x257   : > { %v1728_v31 = vadd.f32 %v1691_v17, %v1678_v13  ;;  %v1729_v34 = vadd.f32 %v1695_v18, %v1679_v16  ;;  %v1730_v37 = vadd.f32 %v1699_v19, %v1680_v21  ;;  %v1731_v9 = vadd.f32 %v1703_v22, %v1681_v27 }
 0x258   : > { %v1732_v38 = vadd.f32 %v1707_v23, %v1682_v28  ;;  %v1733_v39 = vadd.f32 %v1711_v25, %v1683_v30  ;;  %v1734_v42 = vadd.f32 %v1715_v3, %v1684_v35  ;;  %v1735_v45 = vadd.f32 %v1719_v36, %v1685_v8  ;;  %v1970_v30 = vld [vmem:[#allocation3] ss:$0 sm:$0xff] }
 0x259   : > { %v1744_v40 = vmul.f32 0.01, %v1728_v31  ;;  %vm1736_vm0 = vcmp.ge.f32.partialorder %v1728_v31, 0.0  ;;  %v1745_v43 = vmul.f32 0.01, %v1729_v34  ;;  %vm1737_vm1 = vcmp.ge.f32.partialorder %v1729_v34, 0.0 }
 0x25a   : > { %vm1738_vm2 = vcmp.ge.f32.partialorder %v1730_v37, 0.0  ;;  %v1746_v46 = vmul.f32 0.01, %v1730_v37  ;;  %vm1739_vm3 = vcmp.ge.f32.partialorder %v1731_v9, 0.0  ;;  %vm1740_vm4 = vcmp.ge.f32.partialorder %v1732_v38, 0.0 }
 0x25b   : > { %vm1741_vm5 = vcmp.ge.f32.partialorder %v1733_v39, 0.0  ;;  %v1747_v47 = vmul.f32 0.01, %v1731_v9  ;;  %v1748_v48 = vmul.f32 0.01, %v1732_v38  ;;  %v1752_v24 = vsel %vm1736_vm0, %v1728_v31, %v1744_v40 }
 0x25c   : > { %v1768_v29 = vrot.slane %v1761_v41, %v2716_v7  ;;  %v1772_v49 = vrot.slane %v1761_v41, %v2718_v11  ;;  %v1753_v50 = vsel %vm1737_vm1, %v1729_v34, %v1745_v43  ;;  %v1776_v51 = vrot.slane %v1761_v41, %v2720_v14 }
 0x25d   : > { %v1780_v32 = vrot.slane %v1761_v41, %v2725_v26  ;;  %v1784_v52 = vrot.slane %v1762_v44, %v2716_v7  ;;  %v1754_v33 = vsel %vm1738_vm2, %v1730_v37, %v1746_v46  ;;  %v1788_v53 = vrot.slane %v1762_v44, %v2718_v11 }
 0x25e   : > { %v1808_v54 = vrot.slane %v1768_v29, %v2716_v7  ;;  %v1812_v55 = vrot.slane %v1772_v49, %v2716_v7  ;;  %v1749_v56 = vmul.f32 0.01, %v1733_v39  ;;  %v1755_v57 = vsel %vm1739_vm3, %v1731_v9, %v1747_v47 }
 0x25f   : > { %v1816_v58 = vrot.slane %v1776_v51, %v2716_v7  ;;  %v1820_v59 = vrot.slane %v1780_v32, %v2716_v7  ;;  %v1792_v60 = vrot.slane %v1762_v44, %v2720_v14  ;;  %v1824_v61 = vrot.slane %v1784_v52, %v2716_v7 }
 0x260   : > { %v1837_v62 = vmul.f32 %v1808_v54, %v1752_v24  ;;  %v1838_v63 = vmul.f32 %v1812_v55, %v1753_v50  ;;  %vm1742_vm6 = vcmp.ge.f32.partialorder %v1734_v42, 0.0  ;;  %v1750_v0 = vmul.f32 0.01, %v1734_v42 }
 0x261   : > { %v1756_v1 = vsel %vm1740_vm4, %v1732_v38, %v1748_v48  ;;  %v1839_v2 = vmul.f32 %v1816_v58, %v1754_v33  ;;  %v1796_v4 = vrot.slane %v1762_v44, %v2725_v26  ;;  %v1828_v6 = vrot.slane %v1788_v53, %v2716_v7 }
 0x262   : > { %v1840_v10 = vmul.f32 %v1820_v59, %v1755_v57  ;;  %v1845_v11 = vadd.f32 %v1838_v63, %v1837_v62  ;;  %v1751_v12 = vmul.f32 0.01, %v1735_v45  ;;  %v1757_v13 = vsel %vm1741_vm5, %v1733_v39, %v1749_v56 }
 0x263   : > { %vm1743_vm7 = vcmp.ge.f32.partialorder %v1735_v45, 0.0  ;;  %v1832_v14 = vrot.slane %v1792_v60, %v2716_v7  ;;  %v1841_v15 = vmul.f32 %v1824_v61, %v1756_v1  ;;  %v1758_v17 = vsel %vm1742_vm6, %v1734_v42, %v1750_v0 }
 0x264   : > { %v1846_v16 = vadd.f32 %v1845_v11, %v1839_v2  ;;  %v1836_v18 = vrot.slane %v1796_v4, %v2716_v7  ;;  %v1842_v19 = vmul.f32 %v1828_v6, %v1757_v13  ;;  %v1759_v21 = vsel %vm1743_vm7, %v1735_v45, %v1751_v12 }
 0x265   : > { %v1843_v22 = vmul.f32 %v1832_v14, %v1758_v17 }
 0x266   : > { %v1847_v20 = vadd.f32 %v1846_v16, %v1840_v10  ;;  %v1844_v25 = vmul.f32 %v1836_v18, %v1759_v21 }
 0x268   : > { %v1848_v23 = vadd.f32 %v1847_v20, %v1841_v15 }
 0x26a   : > { %v1849_v26 = vadd.f32 %v1848_v23, %v1842_v19 }
 0x26c   : > { %v1850_v27 = vadd.f32 %v1849_v26, %v1843_v22 }
 0x26e   : > { %v1851_v28 = vadd.f32 %v1850_v27, %v1844_v25 }
 0x270   : > { %1852 = vadd.xlane.f32.xlu0 %v1851_v28 }
 0x2f9   : > { %v1853_v31 = vpop.xlane.xlu0 %1852 }
 0x2fa   : > { %v1861_v3 = vadd.f32 %v1970_v30, %v1853_v31 }
 0x2fc   : > { %v1862_v34 = vsub.f32 0.0, %v1861_v3 }
 0x2fe   : > { %v1863_v5 = vmul.f32 1.442695, %v1862_v34 }
 0x300   : > { %2048 = vpow2.f32 %v1863_v5 }
 0x30d   : > { %v2049_v35 = vpop.eup %2048 }
 0x30e   : > { %v1865_v36 = vadd.f32 1.0, %v2049_v35 }
 0x310   : > { %2050 = vrcp.f32 %v1865_v36 }
 0x31d   : > { %v2051_v7 = vpop.eup %2050 }
 0x31e   : > { %1869 = vst.msk [vmem:[%s2768_s5] sm:$0xff] %vm1868_vm8, %v2051_v7 }
 0x31f PF: > { %p21_p1 = scmp.ge.s32.totalorder %s2293_s6, 8   ;;  %s2783_s20 = smov %s2198_s21 }
 0x320   : > { %s2784_s21 = smov %s2202_s22  ;;  %s2785_s22 = smov %s2320_s15 }
 0x321   : > { %s2786_s23 = smov %s2293_s6  ;;  %23 = sbr.rel (!%p21_p1) target bundleno = 9 (0x9), region = 105 }
 0x326   :  { %1881 = vsyncpa [#allocation5], 1 }
 0x327   :  { %1883 = vsyncpa [#allocation5 + $0x1], 1 }
 0x328   :  { %1884 = vsyncpa [#allocation7], 1 }
 0x329   :  { %1886 = vsyncpa [#allocation7 + $0x1], 1 }
 0x32a   :  { %1887 = vsyncpa [#allocation10], 1 }

</bundles_post_ra>
